<compile_context>
chip_gen: v5e
topology: v5e:2x2
jax: 0.10.0
libtpu: 0.0.40
codegen_flags: <defaults>
</compile_context>

<pallas_src>
import functools

import numpy as np
import jax
import jax.numpy as jnp
from jax import lax
from jax.experimental import pallas as pl
from jax.experimental.pallas import tpu as pltpu


def _tap_masks(K, D, H, W):
    """Combined (kh, kw) validity masks over the flattened H*W lane dim.

    masks[kh*K+kw, d, h*W+w] = 1.0 iff the (kh, kw) tap's neighbour
    (h+kh-p, w+kw-p) lies inside the H x W plane, else 0.0 (this is the conv's
    H/W zero padding expressed on the flattened layout).  Pre-broadcast over D
    so the kernel never broadcasts across sublanes in the tap loop.
    """
    p = K // 2
    hw = np.arange(H * W)
    h, w = hw // W, hw % W
    out = np.empty((K * K, D, H * W), np.float32)
    for kh in range(K):
        for kw in range(K):
            ok = ((h + kh - p >= 0) & (h + kh - p < H) &
                  (w + kw - p >= 0) & (w + kw - p < W))
            out[kh * K + kw] = ok.astype(np.float32)  # broadcasts over D
    return out


def _make_kernel(C, D, H, W, K, B):
    p = K // 2
    HW = H * W
    HWB = HW + 2 * B          # bordered lane extent of the pooled planes

    def kernel(x_ref, m_ref, w_ref, o_ref, plane_ref):
        # x_ref    : (nb, C, D, HW)          VMEM  input block (D sublanes, HW lanes)
        # m_ref    : (K*K, D, HW)            VMEM  resident (kh,kw) validity masks
        # w_ref    : (2*K*K*K,)              SMEM  flattened conv weights
        # o_ref    : (nb, D, HW)             VMEM  output block
        # plane_ref: (2, nb, D+2p, HW+2B)    VMEM  zero-haloed [avg, max] planes
        nb = x_ref.shape[0]

        # ---- zero only the halo (D pad rows + lane borders); the interior is
        # fully overwritten by the pooled stores below.  Done every step so the
        # kernel is safe when the parallel grid axis is split across cores.
        if B > 0:
            plane_ref[:, :, :, :B] = jnp.zeros((2, nb, D + 2 * p, B), jnp.float32)
            plane_ref[:, :, :, B + HW:] = jnp.zeros((2, nb, D + 2 * p, B), jnp.float32)
        if p > 0:
            plane_ref[:, :, :p, B:B + HW] = jnp.zeros((2, nb, p, HW), jnp.float32)
            plane_ref[:, :, p + D:, B:B + HW] = jnp.zeros((2, nb, p, HW), jnp.float32)

        # ---- channel mean / max, streamed over C (no full f32 input copy) ----
        x0 = x_ref[:, 0, :, :].astype(jnp.float32)          # (nb, D, HW)
        csum, cmax = x0, x0
        for c in range(1, C):
            xc = x_ref[:, c, :, :].astype(jnp.float32)
            csum = csum + xc
            cmax = jnp.maximum(cmax, xc)
        plane_ref[0, :, p:p + D, B:B + HW] = csum * jnp.float32(1.0 / C)
        plane_ref[1, :, p:p + D, B:B + HW] = cmax

        # ---- 2*K^3-tap shift-and-accumulate 3D conv (zero padding) ----
        # For each (kh, kw): sum the 2*K weighted (ci, kd) windows, then apply
        # the combined H/W validity mask once.  D padding comes from the real
        # zero halo rows, so kd needs no mask.
        acc = jnp.zeros((nb, D, HW), jnp.float32)
        for kh in range(K):
            for kw in range(K):
                s = B + (kh - p) * W + (kw - p)              # lane window start
                inner = None
                for ci in range(2):                           # 0: avg, 1: max
                    for kd in range(K):
                        wgt = w_ref[((ci * K + kd) * K + kh) * K + kw]
                        win = plane_ref[ci, :, kd:kd + D, s:s + HW]   # (nb, D, HW)
                        term = win * wgt                      # scalar broadcast
                        inner = term if inner is None else inner + term
                acc = acc + inner * m_ref[kh * K + kw]        # one mask mul / tap

        # Output is tiny (nb*D*HW); sigmoid cost is negligible either way, so we
        # keep jax.nn.sigmoid for bit-level agreement with the XLA reference.
        o_ref[...] = jax.nn.sigmoid(acc).astype(o_ref.dtype)

    return kernel


def _pick_nb(N, per_batch_bytes, fixed_bytes, *, budget=16 << 20):
    """Largest divisor of N whose per-step VMEM footprint fits `budget`, while
    keeping >= 2 grid steps when N > 1 so the "parallel" axis can shard across
    v7x's two TensorCores (costs only ~0.35us/step on single-TC v5e/v6e)."""
    best = 1
    for cand in range(1, N + 1):
        if N % cand:
            continue
        if N > 1 and N // cand < 2:
            continue
        if fixed_bytes + cand * per_batch_bytes > budget:
            continue
        best = cand
    return best


@functools.partial(jax.jit, static_argnames=("kernel_size",))
def spatial_attention(x, weight, *, kernel_size):
    """x: (N, C, D, H, W);  weight: (1, 2, K, K, K)  ->  (N, 1, D, H, W)."""
    N, C, D, H, W = x.shape
    K = kernel_size
    p = K // 2
    HW = H * W

    # Lane border of the pooled planes: >= max |(kh-p)*W + (kw-p)|, rounded up
    # to a multiple of 128 so the interior stores stay lane-aligned.
    B = (-(-(p * W + p) // 128)) * 128 if p > 0 else 0

    # Sublane/lane-dense layout: (D, HW) as the trailing dims (free reshape).
    x4 = x.reshape(N, C, D, HW)
    w_flat = weight.reshape(-1).astype(jnp.float32)          # (2*K^3,)
    masks = jnp.asarray(_tap_masks(K, D, H, W))              # (K*K, D, HW)

    # Full per-step footprint: double-buffered in/out blocks + f32 plane scratch
    # (+ resident masks), not just raw input bytes.
    itemsize = x.dtype.itemsize
    plane_bytes = 2 * (D + 2 * p) * (HW + 2 * B) * 4
    per_batch = 2 * C * D * HW * itemsize + 2 * D * HW * itemsize + plane_bytes
    fixed = K * K * D * HW * 4
    nb = _pick_nb(N, per_batch, fixed)
    grid = (N // nb,)
    footprint = fixed + nb * per_batch
    vmem_limit = int(min(32 << 20, max(4 * footprint, 8 << 20)))

    out = pl.pallas_call(
        _make_kernel(C, D, H, W, K, B),
        out_shape=jax.ShapeDtypeStruct((N, D, HW), x.dtype),
        grid=grid,
        in_specs=[
            pl.BlockSpec((nb, C, D, HW), lambda i: (i, 0, 0, 0)),
            pl.BlockSpec((K * K, D, HW), lambda i: (0, 0, 0)),   # resident masks
            pl.BlockSpec(memory_space=pltpu.MemorySpace.SMEM),   # conv weights
        ],
        out_specs=pl.BlockSpec((nb, D, HW), lambda i: (i, 0, 0)),
        scratch_shapes=[pltpu.VMEM((2, nb, D + 2 * p, HW + 2 * B), jnp.float32)],
        compiler_params=pltpu.CompilerParams(
            dimension_semantics=("parallel",),
            vmem_limit_bytes=vmem_limit),
    )(x4, masks, w_flat)

    return out.reshape(N, 1, D, H, W)


def _reference(x, weight, kernel_size):
    p = kernel_size // 2
    avg = jnp.mean(x, axis=1, keepdims=True)
    mx = jnp.max(x, axis=1, keepdims=True)
    cat = jnp.concatenate([avg, mx], axis=1)
    y = lax.conv_general_dilated(
        cat, weight, window_strides=(1, 1, 1), padding=[(p, p)] * 3,
        dimension_numbers=("NCDHW", "OIDHW", "NCDHW"))
    return jax.nn.sigmoid(y)


if __name__ == "__main__":
    # Small shapes consistent with the module: N=2, C=4, D=8, H=16, W=16, k=3.
    N, C, D, H, W = 2, 4, 8, 16, 16
    K = 3

    key = jax.random.PRNGKey(0)
    kx, kw = jax.random.split(key)
    x = jax.random.normal(kx, (N, C, D, H, W), dtype=jnp.float32)

    # Deterministic Conv3d(2, 1, K, bias=False) init (kaiming-uniform style bound).
    fan_in = 2 * K * K * K
    bound = 1.0 / (fan_in ** 0.5)
    weight = jax.random.uniform(kw, (1, 2, K, K, K), dtype=jnp.float32,
                                minval=-bound, maxval=bound)

    out = jax.block_until_ready(spatial_attention(x, weight, kernel_size=K))
    ref = jax.block_until_ready(_reference(x, weight, K))

    assert out.shape == (N, 1, D, H, W), out.shape
    assert jnp.allclose(out, ref, atol=1e-5, rtol=1e-5), float(
        jnp.max(jnp.abs(out - ref)))

    print("KERNEL_OK")
</pallas_src>

<mosaic_0001>
module attributes {stable_mosaic.version = 11 : i64} {
  func.func @kernel(%arg0: i32, %arg1: memref<1x4x8x256xf32, #tpu.memory_space<vmem>>, %arg2: memref<9x8x256xf32, #tpu.memory_space<vmem>>, %arg3: memref<54xf32, #tpu.memory_space<smem>>, %arg4: memref<1x8x256xf32, #tpu.memory_space<vmem>>, %arg5: memref<2x1x10x512xf32, #tpu.memory_space<vmem>>) attributes {dimension_semantics = [#tpu.dimension_semantics<parallel>], iteration_bounds = array<i64: 2>, scalar_prefetch = 0 : i64, scratch_operands = 1 : i64, tpu.core_type = #tpu.core_type<tc>, window_params = [{transform_indices = @transform_0, window_bounds = array<i64: 1, 4, 8, 256>}, {pipeline_mode = #tpu.pipeline_mode<synchronous>, transform_indices = @transform_1, window_bounds = array<i64: 9, 8, 256>}, {transform_indices = @transform_2, window_bounds = array<i64: 54>}, {transform_indices = @transform_3, window_bounds = array<i64: 1, 8, 256>}]} {
    %cst = arith.constant 0.000000e+00 : f32
    %0 = vector.broadcast %cst : f32 to vector<2x1x10x128xf32>
    %c0 = arith.constant 0 : index
    %c0_0 = arith.constant 0 : index
    %c0_1 = arith.constant 0 : index
    %c0_2 = arith.constant 0 : index
    %1 = vector.load %arg5[%c0, %c0_0, %c0_1, %c0_2] : memref<2x1x10x512xf32, #tpu.memory_space<vmem>>, vector<2x1x10x128xf32>
    tpu.vector_store %arg5[%c0, %c0_0, %c0_1, %c0_2], %0 {strides = array<i32>} : memref<2x1x10x512xf32, #tpu.memory_space<vmem>>, vector<2x1x10x128xf32>,
    %cst_3 = arith.constant 0.000000e+00 : f32
    %2 = vector.broadcast %cst_3 : f32 to vector<2x1x10x128xf32>
    %c0_4 = arith.constant 0 : index
    %c0_5 = arith.constant 0 : index
    %c0_6 = arith.constant 0 : index
    %c384 = arith.constant 384 : index
    %3 = vector.load %arg5[%c0_4, %c0_5, %c0_6, %c384] : memref<2x1x10x512xf32, #tpu.memory_space<vmem>>, vector<2x1x10x128xf32>
    tpu.vector_store %arg5[%c0_4, %c0_5, %c0_6, %c384], %2 {strides = array<i32>} : memref<2x1x10x512xf32, #tpu.memory_space<vmem>>, vector<2x1x10x128xf32>,
    %cst_7 = arith.constant 0.000000e+00 : f32
    %4 = vector.broadcast %cst_7 : f32 to vector<2x1x1x256xf32>
    %c0_8 = arith.constant 0 : index
    %c0_9 = arith.constant 0 : index
    %c0_10 = arith.constant 0 : index
    %c128 = arith.constant 128 : index
    %5 = vector.load %arg5[%c0_8, %c0_9, %c0_10, %c128] : memref<2x1x10x512xf32, #tpu.memory_space<vmem>>, vector<2x1x1x256xf32>
    tpu.vector_store %arg5[%c0_8, %c0_9, %c0_10, %c128], %4 {strides = array<i32>} : memref<2x1x10x512xf32, #tpu.memory_space<vmem>>, vector<2x1x1x256xf32>,
    %cst_11 = arith.constant 0.000000e+00 : f32
    %6 = vector.broadcast %cst_11 : f32 to vector<2x1x1x256xf32>
    %c0_12 = arith.constant 0 : index
    %c0_13 = arith.constant 0 : index
    %c9 = arith.constant 9 : index
    %c128_14 = arith.constant 128 : index
    %7 = vector.load %arg5[%c0_12, %c0_13, %c9, %c128_14] : memref<2x1x10x512xf32, #tpu.memory_space<vmem>>, vector<2x1x1x256xf32>
    tpu.vector_store %arg5[%c0_12, %c0_13, %c9, %c128_14], %6 {strides = array<i32>} : memref<2x1x10x512xf32, #tpu.memory_space<vmem>>, vector<2x1x1x256xf32>,
    %c0_15 = arith.constant 0 : index
    %c0_16 = arith.constant 0 : index
    %c0_17 = arith.constant 0 : index
    %c0_18 = arith.constant 0 : index
    %8 = vector.load %arg1[%c0_15, %c0_16, %c0_17, %c0_18] : memref<1x4x8x256xf32, #tpu.memory_space<vmem>>, vector<1x1x8x256xf32>
    %9 = vector.shape_cast %8 : vector<1x1x8x256xf32> to vector<1x8x256xf32>
    %c0_19 = arith.constant 0 : index
    %c1 = arith.constant 1 : index
    %c0_20 = arith.constant 0 : index
    %c0_21 = arith.constant 0 : index
    %10 = vector.load %arg1[%c0_19, %c1, %c0_20, %c0_21] : memref<1x4x8x256xf32, #tpu.memory_space<vmem>>, vector<1x1x8x256xf32>
    %11 = vector.shape_cast %10 : vector<1x1x8x256xf32> to vector<1x8x256xf32>
    %12 = arith.addf %9, %11 : vector<1x8x256xf32>
    %13 = arith.maximumf %9, %11 : vector<1x8x256xf32>
    %c0_22 = arith.constant 0 : index
    %c2 = arith.constant 2 : index
    %c0_23 = arith.constant 0 : index
    %c0_24 = arith.constant 0 : index
    %14 = vector.load %arg1[%c0_22, %c2, %c0_23, %c0_24] : memref<1x4x8x256xf32, #tpu.memory_space<vmem>>, vector<1x1x8x256xf32>
    %15 = vector.shape_cast %14 : vector<1x1x8x256xf32> to vector<1x8x256xf32>
    %16 = arith.addf %12, %15 : vector<1x8x256xf32>
    %17 = arith.maximumf %13, %15 : vector<1x8x256xf32>
    %c0_25 = arith.constant 0 : index
    %c3 = arith.constant 3 : index
    %c0_26 = arith.constant 0 : index
    %c0_27 = arith.constant 0 : index
    %18 = vector.load %arg1[%c0_25, %c3, %c0_26, %c0_27] : memref<1x4x8x256xf32, #tpu.memory_space<vmem>>, vector<1x1x8x256xf32>
    %19 = vector.shape_cast %18 : vector<1x1x8x256xf32> to vector<1x8x256xf32>
    %20 = arith.addf %16, %19 : vector<1x8x256xf32>
    %21 = arith.maximumf %17, %19 : vector<1x8x256xf32>
    %cst_28 = arith.constant 2.500000e-01 : f32
    %22 = vector.broadcast %cst_28 : f32 to vector<1x8x256xf32>
    %23 = arith.mulf %20, %22 : vector<1x8x256xf32>
    %c0_29 = arith.constant 0 : index
    %c0_30 = arith.constant 0 : index
    %c1_31 = arith.constant 1 : index
    %c128_32 = arith.constant 128 : index
    %24 = vector.load %arg5[%c0_29, %c0_30, %c1_31, %c128_32] : memref<2x1x10x512xf32, #tpu.memory_space<vmem>>, vector<1x1x8x256xf32>
    %25 = vector.shape_cast %24 : vector<1x1x8x256xf32> to vector<1x8x256xf32>
    %26 = vector.shape_cast %23 : vector<1x8x256xf32> to vector<1x1x8x256xf32>
    tpu.vector_store %arg5[%c0_29, %c0_30, %c1_31, %c128_32], %26 {strides = array<i32>} : memref<2x1x10x512xf32, #tpu.memory_space<vmem>>, vector<1x1x8x256xf32>,
    %c1_33 = arith.constant 1 : index
    %c0_34 = arith.constant 0 : index
    %c1_35 = arith.constant 1 : index
    %c128_36 = arith.constant 128 : index
    %27 = vector.load %arg5[%c1_33, %c0_34, %c1_35, %c128_36] : memref<2x1x10x512xf32, #tpu.memory_space<vmem>>, vector<1x1x8x256xf32>
    %28 = vector.shape_cast %27 : vector<1x1x8x256xf32> to vector<1x8x256xf32>
    %29 = vector.shape_cast %21 : vector<1x8x256xf32> to vector<1x1x8x256xf32>
    tpu.vector_store %arg5[%c1_33, %c0_34, %c1_35, %c128_36], %29 {strides = array<i32>} : memref<2x1x10x512xf32, #tpu.memory_space<vmem>>, vector<1x1x8x256xf32>,
    %cst_37 = arith.constant 0.000000e+00 : f32
    %30 = vector.broadcast %cst_37 : f32 to vector<1x8x256xf32>
    %c0_38 = arith.constant 0 : index
    %31 = memref.load %arg3[%c0_38] : memref<54xf32, #tpu.memory_space<smem>>
    %c0_39 = arith.constant 0 : index
    %c0_40 = arith.constant 0 : index
    %c0_41 = arith.constant 0 : index
    %c111 = arith.constant 111 : index
    %32 = vector.load %arg5[%c0_39, %c0_40, %c0_41, %c111] : memref<2x1x10x512xf32, #tpu.memory_space<vmem>>, vector<1x1x8x256xf32>
    %33 = vector.shape_cast %32 : vector<1x1x8x256xf32> to vector<1x8x256xf32>
    %34 = vector.broadcast %31 : f32 to vector<1x8x256xf32>
    %35 = arith.mulf %33, %34 : vector<1x8x256xf32>
    %c9_42 = arith.constant 9 : index
    %36 = memref.load %arg3[%c9_42] : memref<54xf32, #tpu.memory_space<smem>>
    %c0_43 = arith.constant 0 : index
    %c0_44 = arith.constant 0 : index
    %c1_45 = arith.constant 1 : index
    %c111_46 = arith.constant 111 : index
    %37 = vector.load %arg5[%c0_43, %c0_44, %c1_45, %c111_46] : memref<2x1x10x512xf32, #tpu.memory_space<vmem>>, vector<1x1x8x256xf32>
    %38 = vector.shape_cast %37 : vector<1x1x8x256xf32> to vector<1x8x256xf32>
    %39 = vector.broadcast %36 : f32 to vector<1x8x256xf32>
    %40 = arith.mulf %38, %39 : vector<1x8x256xf32>
    %41 = arith.addf %35, %40 : vector<1x8x256xf32>
    %c18 = arith.constant 18 : index
    %42 = memref.load %arg3[%c18] : memref<54xf32, #tpu.memory_space<smem>>
    %c0_47 = arith.constant 0 : index
    %c0_48 = arith.constant 0 : index
    %c2_49 = arith.constant 2 : index
    %c111_50 = arith.constant 111 : index
    %43 = vector.load %arg5[%c0_47, %c0_48, %c2_49, %c111_50] : memref<2x1x10x512xf32, #tpu.memory_space<vmem>>, vector<1x1x8x256xf32>
    %44 = vector.shape_cast %43 : vector<1x1x8x256xf32> to vector<1x8x256xf32>
    %45 = vector.broadcast %42 : f32 to vector<1x8x256xf32>
    %46 = arith.mulf %44, %45 : vector<1x8x256xf32>
    %47 = arith.addf %41, %46 : vector<1x8x256xf32>
    %c27 = arith.constant 27 : index
    %48 = memref.load %arg3[%c27] : memref<54xf32, #tpu.memory_space<smem>>
    %c1_51 = arith.constant 1 : index
    %c0_52 = arith.constant 0 : index
    %c0_53 = arith.constant 0 : index
    %c111_54 = arith.constant 111 : index
    %49 = vector.load %arg5[%c1_51, %c0_52, %c0_53, %c111_54] : memref<2x1x10x512xf32, #tpu.memory_space<vmem>>, vector<1x1x8x256xf32>
    %50 = vector.shape_cast %49 : vector<1x1x8x256xf32> to vector<1x8x256xf32>
    %51 = vector.broadcast %48 : f32 to vector<1x8x256xf32>
    %52 = arith.mulf %50, %51 : vector<1x8x256xf32>
    %53 = arith.addf %47, %52 : vector<1x8x256xf32>
    %c36 = arith.constant 36 : index
    %54 = memref.load %arg3[%c36] : memref<54xf32, #tpu.memory_space<smem>>
    %c1_55 = arith.constant 1 : index
    %c0_56 = arith.constant 0 : index
    %c1_57 = arith.constant 1 : index
    %c111_58 = arith.constant 111 : index
    %55 = vector.load %arg5[%c1_55, %c0_56, %c1_57, %c111_58] : memref<2x1x10x512xf32, #tpu.memory_space<vmem>>, vector<1x1x8x256xf32>
    %56 = vector.shape_cast %55 : vector<1x1x8x256xf32> to vector<1x8x256xf32>
    %57 = vector.broadcast %54 : f32 to vector<1x8x256xf32>
    %58 = arith.mulf %56, %57 : vector<1x8x256xf32>
    %59 = arith.addf %53, %58 : vector<1x8x256xf32>
    %c45 = arith.constant 45 : index
    %60 = memref.load %arg3[%c45] : memref<54xf32, #tpu.memory_space<smem>>
    %c1_59 = arith.constant 1 : index
    %c0_60 = arith.constant 0 : index
    %c2_61 = arith.constant 2 : index
    %c111_62 = arith.constant 111 : index
    %61 = vector.load %arg5[%c1_59, %c0_60, %c2_61, %c111_62] : memref<2x1x10x512xf32, #tpu.memory_space<vmem>>, vector<1x1x8x256xf32>
    %62 = vector.shape_cast %61 : vector<1x1x8x256xf32> to vector<1x8x256xf32>
    %63 = vector.broadcast %60 : f32 to vector<1x8x256xf32>
    %64 = arith.mulf %62, %63 : vector<1x8x256xf32>
    %65 = arith.addf %59, %64 : vector<1x8x256xf32>
    %c0_63 = arith.constant 0 : index
    %c0_64 = arith.constant 0 : index
    %c0_65 = arith.constant 0 : index
    %66 = vector.load %arg2[%c0_63, %c0_64, %c0_65] : memref<9x8x256xf32, #tpu.memory_space<vmem>>, vector<1x8x256xf32>
    %67 = vector.shape_cast %66 : vector<1x8x256xf32> to vector<8x256xf32>
    %68 = vector.shape_cast %67 : vector<8x256xf32> to vector<1x8x256xf32>
    %69 = arith.mulf %65, %68 : vector<1x8x256xf32>
    %70 = arith.addf %30, %69 : vector<1x8x256xf32>
    %c1_66 = arith.constant 1 : index
    %71 = memref.load %arg3[%c1_66] : memref<54xf32, #tpu.memory_space<smem>>
    %c0_67 = arith.constant 0 : index
    %c0_68 = arith.constant 0 : index
    %c0_69 = arith.constant 0 : index
    %c112 = arith.constant 112 : index
    %72 = vector.load %arg5[%c0_67, %c0_68, %c0_69, %c112] : memref<2x1x10x512xf32, #tpu.memory_space<vmem>>, vector<1x1x8x256xf32>
    %73 = vector.shape_cast %72 : vector<1x1x8x256xf32> to vector<1x8x256xf32>
    %74 = vector.broadcast %71 : f32 to vector<1x8x256xf32>
    %75 = arith.mulf %73, %74 : vector<1x8x256xf32>
    %c10 = arith.constant 10 : index
    %76 = memref.load %arg3[%c10] : memref<54xf32, #tpu.memory_space<smem>>
    %c0_70 = arith.constant 0 : index
    %c0_71 = arith.constant 0 : index
    %c1_72 = arith.constant 1 : index
    %c112_73 = arith.constant 112 : index
    %77 = vector.load %arg5[%c0_70, %c0_71, %c1_72, %c112_73] : memref<2x1x10x512xf32, #tpu.memory_space<vmem>>, vector<1x1x8x256xf32>
    %78 = vector.shape_cast %77 : vector<1x1x8x256xf32> to vector<1x8x256xf32>
    %79 = vector.broadcast %76 : f32 to vector<1x8x256xf32>
    %80 = arith.mulf %78, %79 : vector<1x8x256xf32>
    %81 = arith.addf %75, %80 : vector<1x8x256xf32>
    %c19 = arith.constant 19 : index
    %82 = memref.load %arg3[%c19] : memref<54xf32, #tpu.memory_space<smem>>
    %c0_74 = arith.constant 0 : index
    %c0_75 = arith.constant 0 : index
    %c2_76 = arith.constant 2 : index
    %c112_77 = arith.constant 112 : index
    %83 = vector.load %arg5[%c0_74, %c0_75, %c2_76, %c112_77] : memref<2x1x10x512xf32, #tpu.memory_space<vmem>>, vector<1x1x8x256xf32>
    %84 = vector.shape_cast %83 : vector<1x1x8x256xf32> to vector<1x8x256xf32>
    %85 = vector.broadcast %82 : f32 to vector<1x8x256xf32>
    %86 = arith.mulf %84, %85 : vector<1x8x256xf32>
    %87 = arith.addf %81, %86 : vector<1x8x256xf32>
    %c28 = arith.constant 28 : index
    %88 = memref.load %arg3[%c28] : memref<54xf32, #tpu.memory_space<smem>>
    %c1_78 = arith.constant 1 : index
    %c0_79 = arith.constant 0 : index
    %c0_80 = arith.constant 0 : index
    %c112_81 = arith.constant 112 : index
    %89 = vector.load %arg5[%c1_78, %c0_79, %c0_80, %c112_81] : memref<2x1x10x512xf32, #tpu.memory_space<vmem>>, vector<1x1x8x256xf32>
    %90 = vector.shape_cast %89 : vector<1x1x8x256xf32> to vector<1x8x256xf32>
    %91 = vector.broadcast %88 : f32 to vector<1x8x256xf32>
    %92 = arith.mulf %90, %91 : vector<1x8x256xf32>
    %93 = arith.addf %87, %92 : vector<1x8x256xf32>
    %c37 = arith.constant 37 : index
    %94 = memref.load %arg3[%c37] : memref<54xf32, #tpu.memory_space<smem>>
    %c1_82 = arith.constant 1 : index
    %c0_83 = arith.constant 0 : index
    %c1_84 = arith.constant 1 : index
    %c112_85 = arith.constant 112 : index
    %95 = vector.load %arg5[%c1_82, %c0_83, %c1_84, %c112_85] : memref<2x1x10x512xf32, #tpu.memory_space<vmem>>, vector<1x1x8x256xf32>
    %96 = vector.shape_cast %95 : vector<1x1x8x256xf32> to vector<1x8x256xf32>
    %97 = vector.broadcast %94 : f32 to vector<1x8x256xf32>
    %98 = arith.mulf %96, %97 : vector<1x8x256xf32>
    %99 = arith.addf %93, %98 : vector<1x8x256xf32>
    %c46 = arith.constant 46 : index
    %100 = memref.load %arg3[%c46] : memref<54xf32, #tpu.memory_space<smem>>
    %c1_86 = arith.constant 1 : index
    %c0_87 = arith.constant 0 : index
    %c2_88 = arith.constant 2 : index
    %c112_89 = arith.constant 112 : index
    %101 = vector.load %arg5[%c1_86, %c0_87, %c2_88, %c112_89] : memref<2x1x10x512xf32, #tpu.memory_space<vmem>>, vector<1x1x8x256xf32>
    %102 = vector.shape_cast %101 : vector<1x1x8x256xf32> to vector<1x8x256xf32>
    %103 = vector.broadcast %100 : f32 to vector<1x8x256xf32>
    %104 = arith.mulf %102, %103 : vector<1x8x256xf32>
    %105 = arith.addf %99, %104 : vector<1x8x256xf32>
    %c1_90 = arith.constant 1 : index
    %c0_91 = arith.constant 0 : index
    %c0_92 = arith.constant 0 : index
    %106 = vector.load %arg2[%c1_90, %c0_91, %c0_92] : memref<9x8x256xf32, #tpu.memory_space<vmem>>, vector<1x8x256xf32>
    %107 = vector.shape_cast %106 : vector<1x8x256xf32> to vector<8x256xf32>
    %108 = vector.shape_cast %107 : vector<8x256xf32> to vector<1x8x256xf32>
    %109 = arith.mulf %105, %108 : vector<1x8x256xf32>
    %110 = arith.addf %70, %109 : vector<1x8x256xf32>
    %c2_93 = arith.constant 2 : index
    %111 = memref.load %arg3[%c2_93] : memref<54xf32, #tpu.memory_space<smem>>
    %c0_94 = arith.constant 0 : index
    %c0_95 = arith.constant 0 : index
    %c0_96 = arith.constant 0 : index
    %c113 = arith.constant 113 : index
    %112 = vector.load %arg5[%c0_94, %c0_95, %c0_96, %c113] : memref<2x1x10x512xf32, #tpu.memory_space<vmem>>, vector<1x1x8x256xf32>
    %113 = vector.shape_cast %112 : vector<1x1x8x256xf32> to vector<1x8x256xf32>
    %114 = vector.broadcast %111 : f32 to vector<1x8x256xf32>
    %115 = arith.mulf %113, %114 : vector<1x8x256xf32>
    %c11 = arith.constant 11 : index
    %116 = memref.load %arg3[%c11] : memref<54xf32, #tpu.memory_space<smem>>
    %c0_97 = arith.constant 0 : index
    %c0_98 = arith.constant 0 : index
    %c1_99 = arith.constant 1 : index
    %c113_100 = arith.constant 113 : index
    %117 = vector.load %arg5[%c0_97, %c0_98, %c1_99, %c113_100] : memref<2x1x10x512xf32, #tpu.memory_space<vmem>>, vector<1x1x8x256xf32>
    %118 = vector.shape_cast %117 : vector<1x1x8x256xf32> to vector<1x8x256xf32>
    %119 = vector.broadcast %116 : f32 to vector<1x8x256xf32>
    %120 = arith.mulf %118, %119 : vector<1x8x256xf32>
    %121 = arith.addf %115, %120 : vector<1x8x256xf32>
    %c20 = arith.constant 20 : index
    %122 = memref.load %arg3[%c20] : memref<54xf32, #tpu.memory_space<smem>>
    %c0_101 = arith.constant 0 : index
    %c0_102 = arith.constant 0 : index
    %c2_103 = arith.constant 2 : index
    %c113_104 = arith.constant 113 : index
    %123 = vector.load %arg5[%c0_101, %c0_102, %c2_103, %c113_104] : memref<2x1x10x512xf32, #tpu.memory_space<vmem>>, vector<1x1x8x256xf32>
    %124 = vector.shape_cast %123 : vector<1x1x8x256xf32> to vector<1x8x256xf32>
    %125 = vector.broadcast %122 : f32 to vector<1x8x256xf32>
    %126 = arith.mulf %124, %125 : vector<1x8x256xf32>
    %127 = arith.addf %121, %126 : vector<1x8x256xf32>
    %c29 = arith.constant 29 : index
    %128 = memref.load %arg3[%c29] : memref<54xf32, #tpu.memory_space<smem>>
    %c1_105 = arith.constant 1 : index
    %c0_106 = arith.constant 0 : index
    %c0_107 = arith.constant 0 : index
    %c113_108 = arith.constant 113 : index
    %129 = vector.load %arg5[%c1_105, %c0_106, %c0_107, %c113_108] : memref<2x1x10x512xf32, #tpu.memory_space<vmem>>, vector<1x1x8x256xf32>
    %130 = vector.shape_cast %129 : vector<1x1x8x256xf32> to vector<1x8x256xf32>
    %131 = vector.broadcast %128 : f32 to vector<1x8x256xf32>
    %132 = arith.mulf %130, %131 : vector<1x8x256xf32>
    %133 = arith.addf %127, %132 : vector<1x8x256xf32>
    %c38 = arith.constant 38 : index
    %134 = memref.load %arg3[%c38] : memref<54xf32, #tpu.memory_space<smem>>
    %c1_109 = arith.constant 1 : index
    %c0_110 = arith.constant 0 : index
    %c1_111 = arith.constant 1 : index
    %c113_112 = arith.constant 113 : index
    %135 = vector.load %arg5[%c1_109, %c0_110, %c1_111, %c113_112] : memref<2x1x10x512xf32, #tpu.memory_space<vmem>>, vector<1x1x8x256xf32>
    %136 = vector.shape_cast %135 : vector<1x1x8x256xf32> to vector<1x8x256xf32>
    %137 = vector.broadcast %134 : f32 to vector<1x8x256xf32>
    %138 = arith.mulf %136, %137 : vector<1x8x256xf32>
    %139 = arith.addf %133, %138 : vector<1x8x256xf32>
    %c47 = arith.constant 47 : index
    %140 = memref.load %arg3[%c47] : memref<54xf32, #tpu.memory_space<smem>>
    %c1_113 = arith.constant 1 : index
    %c0_114 = arith.constant 0 : index
    %c2_115 = arith.constant 2 : index
    %c113_116 = arith.constant 113 : index
    %141 = vector.load %arg5[%c1_113, %c0_114, %c2_115, %c113_116] : memref<2x1x10x512xf32, #tpu.memory_space<vmem>>, vector<1x1x8x256xf32>
    %142 = vector.shape_cast %141 : vector<1x1x8x256xf32> to vector<1x8x256xf32>
    %143 = vector.broadcast %140 : f32 to vector<1x8x256xf32>
    %144 = arith.mulf %142, %143 : vector<1x8x256xf32>
    %145 = arith.addf %139, %144 : vector<1x8x256xf32>
    %c2_117 = arith.constant 2 : index
    %c0_118 = arith.constant 0 : index
    %c0_119 = arith.constant 0 : index
    %146 = vector.load %arg2[%c2_117, %c0_118, %c0_119] : memref<9x8x256xf32, #tpu.memory_space<vmem>>, vector<1x8x256xf32>
    %147 = vector.shape_cast %146 : vector<1x8x256xf32> to vector<8x256xf32>
    %148 = vector.shape_cast %147 : vector<8x256xf32> to vector<1x8x256xf32>
    %149 = arith.mulf %145, %148 : vector<1x8x256xf32>
    %150 = arith.addf %110, %149 : vector<1x8x256xf32>
    %c3_120 = arith.constant 3 : index
    %151 = memref.load %arg3[%c3_120] : memref<54xf32, #tpu.memory_space<smem>>
    %c0_121 = arith.constant 0 : index
    %c0_122 = arith.constant 0 : index
    %c0_123 = arith.constant 0 : index
    %c127 = arith.constant 127 : index
    %152 = vector.load %arg5[%c0_121, %c0_122, %c0_123, %c127] : memref<2x1x10x512xf32, #tpu.memory_space<vmem>>, vector<1x1x8x256xf32>
    %153 = vector.shape_cast %152 : vector<1x1x8x256xf32> to vector<1x8x256xf32>
    %154 = vector.broadcast %151 : f32 to vector<1x8x256xf32>
    %155 = arith.mulf %153, %154 : vector<1x8x256xf32>
    %c12 = arith.constant 12 : index
    %156 = memref.load %arg3[%c12] : memref<54xf32, #tpu.memory_space<smem>>
    %c0_124 = arith.constant 0 : index
    %c0_125 = arith.constant 0 : index
    %c1_126 = arith.constant 1 : index
    %c127_127 = arith.constant 127 : index
    %157 = vector.load %arg5[%c0_124, %c0_125, %c1_126, %c127_127] : memref<2x1x10x512xf32, #tpu.memory_space<vmem>>, vector<1x1x8x256xf32>
    %158 = vector.shape_cast %157 : vector<1x1x8x256xf32> to vector<1x8x256xf32>
    %159 = vector.broadcast %156 : f32 to vector<1x8x256xf32>
    %160 = arith.mulf %158, %159 : vector<1x8x256xf32>
    %161 = arith.addf %155, %160 : vector<1x8x256xf32>
    %c21 = arith.constant 21 : index
    %162 = memref.load %arg3[%c21] : memref<54xf32, #tpu.memory_space<smem>>
    %c0_128 = arith.constant 0 : index
    %c0_129 = arith.constant 0 : index
    %c2_130 = arith.constant 2 : index
    %c127_131 = arith.constant 127 : index
    %163 = vector.load %arg5[%c0_128, %c0_129, %c2_130, %c127_131] : memref<2x1x10x512xf32, #tpu.memory_space<vmem>>, vector<1x1x8x256xf32>
    %164 = vector.shape_cast %163 : vector<1x1x8x256xf32> to vector<1x8x256xf32>
    %165 = vector.broadcast %162 : f32 to vector<1x8x256xf32>
    %166 = arith.mulf %164, %165 : vector<1x8x256xf32>
    %167 = arith.addf %161, %166 : vector<1x8x256xf32>
    %c30 = arith.constant 30 : index
    %168 = memref.load %arg3[%c30] : memref<54xf32, #tpu.memory_space<smem>>
    %c1_132 = arith.constant 1 : index
    %c0_133 = arith.constant 0 : index
    %c0_134 = arith.constant 0 : index
    %c127_135 = arith.constant 127 : index
    %169 = vector.load %arg5[%c1_132, %c0_133, %c0_134, %c127_135] : memref<2x1x10x512xf32, #tpu.memory_space<vmem>>, vector<1x1x8x256xf32>
    %170 = vector.shape_cast %169 : vector<1x1x8x256xf32> to vector<1x8x256xf32>
    %171 = vector.broadcast %168 : f32 to vector<1x8x256xf32>
    %172 = arith.mulf %170, %171 : vector<1x8x256xf32>
    %173 = arith.addf %167, %172 : vector<1x8x256xf32>
    %c39 = arith.constant 39 : index
    %174 = memref.load %arg3[%c39] : memref<54xf32, #tpu.memory_space<smem>>
    %c1_136 = arith.constant 1 : index
    %c0_137 = arith.constant 0 : index
    %c1_138 = arith.constant 1 : index
    %c127_139 = arith.constant 127 : index
    %175 = vector.load %arg5[%c1_136, %c0_137, %c1_138, %c127_139] : memref<2x1x10x512xf32, #tpu.memory_space<vmem>>, vector<1x1x8x256xf32>
    %176 = vector.shape_cast %175 : vector<1x1x8x256xf32> to vector<1x8x256xf32>
    %177 = vector.broadcast %174 : f32 to vector<1x8x256xf32>
    %178 = arith.mulf %176, %177 : vector<1x8x256xf32>
    %179 = arith.addf %173, %178 : vector<1x8x256xf32>
    %c48 = arith.constant 48 : index
    %180 = memref.load %arg3[%c48] : memref<54xf32, #tpu.memory_space<smem>>
    %c1_140 = arith.constant 1 : index
    %c0_141 = arith.constant 0 : index
    %c2_142 = arith.constant 2 : index
    %c127_143 = arith.constant 127 : index
    %181 = vector.load %arg5[%c1_140, %c0_141, %c2_142, %c127_143] : memref<2x1x10x512xf32, #tpu.memory_space<vmem>>, vector<1x1x8x256xf32>
    %182 = vector.shape_cast %181 : vector<1x1x8x256xf32> to vector<1x8x256xf32>
    %183 = vector.broadcast %180 : f32 to vector<1x8x256xf32>
    %184 = arith.mulf %182, %183 : vector<1x8x256xf32>
    %185 = arith.addf %179, %184 : vector<1x8x256xf32>
    %c3_144 = arith.constant 3 : index
    %c0_145 = arith.constant 0 : index
    %c0_146 = arith.constant 0 : index
    %186 = vector.load %arg2[%c3_144, %c0_145, %c0_146] : memref<9x8x256xf32, #tpu.memory_space<vmem>>, vector<1x8x256xf32>
    %187 = vector.shape_cast %186 : vector<1x8x256xf32> to vector<8x256xf32>
    %188 = vector.shape_cast %187 : vector<8x256xf32> to vector<1x8x256xf32>
    %189 = arith.mulf %185, %188 : vector<1x8x256xf32>
    %190 = arith.addf %150, %189 : vector<1x8x256xf32>
    %c4 = arith.constant 4 : index
    %191 = memref.load %arg3[%c4] : memref<54xf32, #tpu.memory_space<smem>>
    %c0_147 = arith.constant 0 : index
    %c0_148 = arith.constant 0 : index
    %c0_149 = arith.constant 0 : index
    %c128_150 = arith.constant 128 : index
    %192 = vector.load %arg5[%c0_147, %c0_148, %c0_149, %c128_150] : memref<2x1x10x512xf32, #tpu.memory_space<vmem>>, vector<1x1x8x256xf32>
    %193 = vector.shape_cast %192 : vector<1x1x8x256xf32> to vector<1x8x256xf32>
    %194 = vector.broadcast %191 : f32 to vector<1x8x256xf32>
    %195 = arith.mulf %193, %194 : vector<1x8x256xf32>
    %c13 = arith.constant 13 : index
    %196 = memref.load %arg3[%c13] : memref<54xf32, #tpu.memory_space<smem>>
    %c0_151 = arith.constant 0 : index
    %c0_152 = arith.constant 0 : index
    %c1_153 = arith.constant 1 : index
    %c128_154 = arith.constant 128 : index
    %197 = vector.load %arg5[%c0_151, %c0_152, %c1_153, %c128_154] : memref<2x1x10x512xf32, #tpu.memory_space<vmem>>, vector<1x1x8x256xf32>
    %198 = vector.shape_cast %197 : vector<1x1x8x256xf32> to vector<1x8x256xf32>
    %199 = vector.broadcast %196 : f32 to vector<1x8x256xf32>
    %200 = arith.mulf %198, %199 : vector<1x8x256xf32>
    %201 = arith.addf %195, %200 : vector<1x8x256xf32>
    %c22 = arith.constant 22 : index
    %202 = memref.load %arg3[%c22] : memref<54xf32, #tpu.memory_space<smem>>
    %c0_155 = arith.constant 0 : index
    %c0_156 = arith.constant 0 : index
    %c2_157 = arith.constant 2 : index
    %c128_158 = arith.constant 128 : index
    %203 = vector.load %arg5[%c0_155, %c0_156, %c2_157, %c128_158] : memref<2x1x10x512xf32, #tpu.memory_space<vmem>>, vector<1x1x8x256xf32>
    %204 = vector.shape_cast %203 : vector<1x1x8x256xf32> to vector<1x8x256xf32>
    %205 = vector.broadcast %202 : f32 to vector<1x8x256xf32>
    %206 = arith.mulf %204, %205 : vector<1x8x256xf32>
    %207 = arith.addf %201, %206 : vector<1x8x256xf32>
    %c31 = arith.constant 31 : index
    %208 = memref.load %arg3[%c31] : memref<54xf32, #tpu.memory_space<smem>>
    %c1_159 = arith.constant 1 : index
    %c0_160 = arith.constant 0 : index
    %c0_161 = arith.constant 0 : index
    %c128_162 = arith.constant 128 : index
    %209 = vector.load %arg5[%c1_159, %c0_160, %c0_161, %c128_162] : memref<2x1x10x512xf32, #tpu.memory_space<vmem>>, vector<1x1x8x256xf32>
    %210 = vector.shape_cast %209 : vector<1x1x8x256xf32> to vector<1x8x256xf32>
    %211 = vector.broadcast %208 : f32 to vector<1x8x256xf32>
    %212 = arith.mulf %210, %211 : vector<1x8x256xf32>
    %213 = arith.addf %207, %212 : vector<1x8x256xf32>
    %c40 = arith.constant 40 : index
    %214 = memref.load %arg3[%c40] : memref<54xf32, #tpu.memory_space<smem>>
    %c1_163 = arith.constant 1 : index
    %c0_164 = arith.constant 0 : index
    %c1_165 = arith.constant 1 : index
    %c128_166 = arith.constant 128 : index
    %215 = vector.load %arg5[%c1_163, %c0_164, %c1_165, %c128_166] : memref<2x1x10x512xf32, #tpu.memory_space<vmem>>, vector<1x1x8x256xf32>
    %216 = vector.shape_cast %215 : vector<1x1x8x256xf32> to vector<1x8x256xf32>
    %217 = vector.broadcast %214 : f32 to vector<1x8x256xf32>
    %218 = arith.mulf %216, %217 : vector<1x8x256xf32>
    %219 = arith.addf %213, %218 : vector<1x8x256xf32>
    %c49 = arith.constant 49 : index
    %220 = memref.load %arg3[%c49] : memref<54xf32, #tpu.memory_space<smem>>
    %c1_167 = arith.constant 1 : index
    %c0_168 = arith.constant 0 : index
    %c2_169 = arith.constant 2 : index
    %c128_170 = arith.constant 128 : index
    %221 = vector.load %arg5[%c1_167, %c0_168, %c2_169, %c128_170] : memref<2x1x10x512xf32, #tpu.memory_space<vmem>>, vector<1x1x8x256xf32>
    %222 = vector.shape_cast %221 : vector<1x1x8x256xf32> to vector<1x8x256xf32>
    %223 = vector.broadcast %220 : f32 to vector<1x8x256xf32>
    %224 = arith.mulf %222, %223 : vector<1x8x256xf32>
    %225 = arith.addf %219, %224 : vector<1x8x256xf32>
    %c4_171 = arith.constant 4 : index
    %c0_172 = arith.constant 0 : index
    %c0_173 = arith.constant 0 : index
    %226 = vector.load %arg2[%c4_171, %c0_172, %c0_173] : memref<9x8x256xf32, #tpu.memory_space<vmem>>, vector<1x8x256xf32>
    %227 = vector.shape_cast %226 : vector<1x8x256xf32> to vector<8x256xf32>
    %228 = vector.shape_cast %227 : vector<8x256xf32> to vector<1x8x256xf32>
    %229 = arith.mulf %225, %228 : vector<1x8x256xf32>
    %230 = arith.addf %190, %229 : vector<1x8x256xf32>
    %c5 = arith.constant 5 : index
    %231 = memref.load %arg3[%c5] : memref<54xf32, #tpu.memory_space<smem>>
    %c0_174 = arith.constant 0 : index
    %c0_175 = arith.constant 0 : index
    %c0_176 = arith.constant 0 : index
    %c129 = arith.constant 129 : index
    %232 = vector.load %arg5[%c0_174, %c0_175, %c0_176, %c129] : memref<2x1x10x512xf32, #tpu.memory_space<vmem>>, vector<1x1x8x256xf32>
    %233 = vector.shape_cast %232 : vector<1x1x8x256xf32> to vector<1x8x256xf32>
    %234 = vector.broadcast %231 : f32 to vector<1x8x256xf32>
    %235 = arith.mulf %233, %234 : vector<1x8x256xf32>
    %c14 = arith.constant 14 : index
    %236 = memref.load %arg3[%c14] : memref<54xf32, #tpu.memory_space<smem>>
    %c0_177 = arith.constant 0 : index
    %c0_178 = arith.constant 0 : index
    %c1_179 = arith.constant 1 : index
    %c129_180 = arith.constant 129 : index
    %237 = vector.load %arg5[%c0_177, %c0_178, %c1_179, %c129_180] : memref<2x1x10x512xf32, #tpu.memory_space<vmem>>, vector<1x1x8x256xf32>
    %238 = vector.shape_cast %237 : vector<1x1x8x256xf32> to vector<1x8x256xf32>
    %239 = vector.broadcast %236 : f32 to vector<1x8x256xf32>
    %240 = arith.mulf %238, %239 : vector<1x8x256xf32>
    %241 = arith.addf %235, %240 : vector<1x8x256xf32>
    %c23 = arith.constant 23 : index
    %242 = memref.load %arg3[%c23] : memref<54xf32, #tpu.memory_space<smem>>
    %c0_181 = arith.constant 0 : index
    %c0_182 = arith.constant 0 : index
    %c2_183 = arith.constant 2 : index
    %c129_184 = arith.constant 129 : index
    %243 = vector.load %arg5[%c0_181, %c0_182, %c2_183, %c129_184] : memref<2x1x10x512xf32, #tpu.memory_space<vmem>>, vector<1x1x8x256xf32>
    %244 = vector.shape_cast %243 : vector<1x1x8x256xf32> to vector<1x8x256xf32>
    %245 = vector.broadcast %242 : f32 to vector<1x8x256xf32>
    %246 = arith.mulf %244, %245 : vector<1x8x256xf32>
    %247 = arith.addf %241, %246 : vector<1x8x256xf32>
    %c32 = arith.constant 32 : index
    %248 = memref.load %arg3[%c32] : memref<54xf32, #tpu.memory_space<smem>>
    %c1_185 = arith.constant 1 : index
    %c0_186 = arith.constant 0 : index
    %c0_187 = arith.constant 0 : index
    %c129_188 = arith.constant 129 : index
    %249 = vector.load %arg5[%c1_185, %c0_186, %c0_187, %c129_188] : memref<2x1x10x512xf32, #tpu.memory_space<vmem>>, vector<1x1x8x256xf32>
    %250 = vector.shape_cast %249 : vector<1x1x8x256xf32> to vector<1x8x256xf32>
    %251 = vector.broadcast %248 : f32 to vector<1x8x256xf32>
    %252 = arith.mulf %250, %251 : vector<1x8x256xf32>
    %253 = arith.addf %247, %252 : vector<1x8x256xf32>
    %c41 = arith.constant 41 : index
    %254 = memref.load %arg3[%c41] : memref<54xf32, #tpu.memory_space<smem>>
    %c1_189 = arith.constant 1 : index
    %c0_190 = arith.constant 0 : index
    %c1_191 = arith.constant 1 : index
    %c129_192 = arith.constant 129 : index
    %255 = vector.load %arg5[%c1_189, %c0_190, %c1_191, %c129_192] : memref<2x1x10x512xf32, #tpu.memory_space<vmem>>, vector<1x1x8x256xf32>
    %256 = vector.shape_cast %255 : vector<1x1x8x256xf32> to vector<1x8x256xf32>
    %257 = vector.broadcast %254 : f32 to vector<1x8x256xf32>
    %258 = arith.mulf %256, %257 : vector<1x8x256xf32>
    %259 = arith.addf %253, %258 : vector<1x8x256xf32>
    %c50 = arith.constant 50 : index
    %260 = memref.load %arg3[%c50] : memref<54xf32, #tpu.memory_space<smem>>
    %c1_193 = arith.constant 1 : index
    %c0_194 = arith.constant 0 : index
    %c2_195 = arith.constant 2 : index
    %c129_196 = arith.constant 129 : index
    %261 = vector.load %arg5[%c1_193, %c0_194, %c2_195, %c129_196] : memref<2x1x10x512xf32, #tpu.memory_space<vmem>>, vector<1x1x8x256xf32>
    %262 = vector.shape_cast %261 : vector<1x1x8x256xf32> to vector<1x8x256xf32>
    %263 = vector.broadcast %260 : f32 to vector<1x8x256xf32>
    %264 = arith.mulf %262, %263 : vector<1x8x256xf32>
    %265 = arith.addf %259, %264 : vector<1x8x256xf32>
    %c5_197 = arith.constant 5 : index
    %c0_198 = arith.constant 0 : index
    %c0_199 = arith.constant 0 : index
    %266 = vector.load %arg2[%c5_197, %c0_198, %c0_199] : memref<9x8x256xf32, #tpu.memory_space<vmem>>, vector<1x8x256xf32>
    %267 = vector.shape_cast %266 : vector<1x8x256xf32> to vector<8x256xf32>
    %268 = vector.shape_cast %267 : vector<8x256xf32> to vector<1x8x256xf32>
    %269 = arith.mulf %265, %268 : vector<1x8x256xf32>
    %270 = arith.addf %230, %269 : vector<1x8x256xf32>
    %c6 = arith.constant 6 : index
    %271 = memref.load %arg3[%c6] : memref<54xf32, #tpu.memory_space<smem>>
    %c0_200 = arith.constant 0 : index
    %c0_201 = arith.constant 0 : index
    %c0_202 = arith.constant 0 : index
    %c143 = arith.constant 143 : index
    %272 = vector.load %arg5[%c0_200, %c0_201, %c0_202, %c143] : memref<2x1x10x512xf32, #tpu.memory_space<vmem>>, vector<1x1x8x256xf32>
    %273 = vector.shape_cast %272 : vector<1x1x8x256xf32> to vector<1x8x256xf32>
    %274 = vector.broadcast %271 : f32 to vector<1x8x256xf32>
    %275 = arith.mulf %273, %274 : vector<1x8x256xf32>
    %c15 = arith.constant 15 : index
    %276 = memref.load %arg3[%c15] : memref<54xf32, #tpu.memory_space<smem>>
    %c0_203 = arith.constant 0 : index
    %c0_204 = arith.constant 0 : index
    %c1_205 = arith.constant 1 : index
    %c143_206 = arith.constant 143 : index
    %277 = vector.load %arg5[%c0_203, %c0_204, %c1_205, %c143_206] : memref<2x1x10x512xf32, #tpu.memory_space<vmem>>, vector<1x1x8x256xf32>
    %278 = vector.shape_cast %277 : vector<1x1x8x256xf32> to vector<1x8x256xf32>
    %279 = vector.broadcast %276 : f32 to vector<1x8x256xf32>
    %280 = arith.mulf %278, %279 : vector<1x8x256xf32>
    %281 = arith.addf %275, %280 : vector<1x8x256xf32>
    %c24 = arith.constant 24 : index
    %282 = memref.load %arg3[%c24] : memref<54xf32, #tpu.memory_space<smem>>
    %c0_207 = arith.constant 0 : index
    %c0_208 = arith.constant 0 : index
    %c2_209 = arith.constant 2 : index
    %c143_210 = arith.constant 143 : index
    %283 = vector.load %arg5[%c0_207, %c0_208, %c2_209, %c143_210] : memref<2x1x10x512xf32, #tpu.memory_space<vmem>>, vector<1x1x8x256xf32>
    %284 = vector.shape_cast %283 : vector<1x1x8x256xf32> to vector<1x8x256xf32>
    %285 = vector.broadcast %282 : f32 to vector<1x8x256xf32>
    %286 = arith.mulf %284, %285 : vector<1x8x256xf32>
    %287 = arith.addf %281, %286 : vector<1x8x256xf32>
    %c33 = arith.constant 33 : index
    %288 = memref.load %arg3[%c33] : memref<54xf32, #tpu.memory_space<smem>>
    %c1_211 = arith.constant 1 : index
    %c0_212 = arith.constant 0 : index
    %c0_213 = arith.constant 0 : index
    %c143_214 = arith.constant 143 : index
    %289 = vector.load %arg5[%c1_211, %c0_212, %c0_213, %c143_214] : memref<2x1x10x512xf32, #tpu.memory_space<vmem>>, vector<1x1x8x256xf32>
    %290 = vector.shape_cast %289 : vector<1x1x8x256xf32> to vector<1x8x256xf32>
    %291 = vector.broadcast %288 : f32 to vector<1x8x256xf32>
    %292 = arith.mulf %290, %291 : vector<1x8x256xf32>
    %293 = arith.addf %287, %292 : vector<1x8x256xf32>
    %c42 = arith.constant 42 : index
    %294 = memref.load %arg3[%c42] : memref<54xf32, #tpu.memory_space<smem>>
    %c1_215 = arith.constant 1 : index
    %c0_216 = arith.constant 0 : index
    %c1_217 = arith.constant 1 : index
    %c143_218 = arith.constant 143 : index
    %295 = vector.load %arg5[%c1_215, %c0_216, %c1_217, %c143_218] : memref<2x1x10x512xf32, #tpu.memory_space<vmem>>, vector<1x1x8x256xf32>
    %296 = vector.shape_cast %295 : vector<1x1x8x256xf32> to vector<1x8x256xf32>
    %297 = vector.broadcast %294 : f32 to vector<1x8x256xf32>
    %298 = arith.mulf %296, %297 : vector<1x8x256xf32>
    %299 = arith.addf %293, %298 : vector<1x8x256xf32>
    %c51 = arith.constant 51 : index
    %300 = memref.load %arg3[%c51] : memref<54xf32, #tpu.memory_space<smem>>
    %c1_219 = arith.constant 1 : index
    %c0_220 = arith.constant 0 : index
    %c2_221 = arith.constant 2 : index
    %c143_222 = arith.constant 143 : index
    %301 = vector.load %arg5[%c1_219, %c0_220, %c2_221, %c143_222] : memref<2x1x10x512xf32, #tpu.memory_space<vmem>>, vector<1x1x8x256xf32>
    %302 = vector.shape_cast %301 : vector<1x1x8x256xf32> to vector<1x8x256xf32>
    %303 = vector.broadcast %300 : f32 to vector<1x8x256xf32>
    %304 = arith.mulf %302, %303 : vector<1x8x256xf32>
    %305 = arith.addf %299, %304 : vector<1x8x256xf32>
    %c6_223 = arith.constant 6 : index
    %c0_224 = arith.constant 0 : index
    %c0_225 = arith.constant 0 : index
    %306 = vector.load %arg2[%c6_223, %c0_224, %c0_225] : memref<9x8x256xf32, #tpu.memory_space<vmem>>, vector<1x8x256xf32>
    %307 = vector.shape_cast %306 : vector<1x8x256xf32> to vector<8x256xf32>
    %308 = vector.shape_cast %307 : vector<8x256xf32> to vector<1x8x256xf32>
    %309 = arith.mulf %305, %308 : vector<1x8x256xf32>
    %310 = arith.addf %270, %309 : vector<1x8x256xf32>
    %c7 = arith.constant 7 : index
    %311 = memref.load %arg3[%c7] : memref<54xf32, #tpu.memory_space<smem>>
    %c0_226 = arith.constant 0 : index
    %c0_227 = arith.constant 0 : index
    %c0_228 = arith.constant 0 : index
    %c144 = arith.constant 144 : index
    %312 = vector.load %arg5[%c0_226, %c0_227, %c0_228, %c144] : memref<2x1x10x512xf32, #tpu.memory_space<vmem>>, vector<1x1x8x256xf32>
    %313 = vector.shape_cast %312 : vector<1x1x8x256xf32> to vector<1x8x256xf32>
    %314 = vector.broadcast %311 : f32 to vector<1x8x256xf32>
    %315 = arith.mulf %313, %314 : vector<1x8x256xf32>
    %c16 = arith.constant 16 : index
    %316 = memref.load %arg3[%c16] : memref<54xf32, #tpu.memory_space<smem>>
    %c0_229 = arith.constant 0 : index
    %c0_230 = arith.constant 0 : index
    %c1_231 = arith.constant 1 : index
    %c144_232 = arith.constant 144 : index
    %317 = vector.load %arg5[%c0_229, %c0_230, %c1_231, %c144_232] : memref<2x1x10x512xf32, #tpu.memory_space<vmem>>, vector<1x1x8x256xf32>
    %318 = vector.shape_cast %317 : vector<1x1x8x256xf32> to vector<1x8x256xf32>
    %319 = vector.broadcast %316 : f32 to vector<1x8x256xf32>
    %320 = arith.mulf %318, %319 : vector<1x8x256xf32>
    %321 = arith.addf %315, %320 : vector<1x8x256xf32>
    %c25 = arith.constant 25 : index
    %322 = memref.load %arg3[%c25] : memref<54xf32, #tpu.memory_space<smem>>
    %c0_233 = arith.constant 0 : index
    %c0_234 = arith.constant 0 : index
    %c2_235 = arith.constant 2 : index
    %c144_236 = arith.constant 144 : index
    %323 = vector.load %arg5[%c0_233, %c0_234, %c2_235, %c144_236] : memref<2x1x10x512xf32, #tpu.memory_space<vmem>>, vector<1x1x8x256xf32>
    %324 = vector.shape_cast %323 : vector<1x1x8x256xf32> to vector<1x8x256xf32>
    %325 = vector.broadcast %322 : f32 to vector<1x8x256xf32>
    %326 = arith.mulf %324, %325 : vector<1x8x256xf32>
    %327 = arith.addf %321, %326 : vector<1x8x256xf32>
    %c34 = arith.constant 34 : index
    %328 = memref.load %arg3[%c34] : memref<54xf32, #tpu.memory_space<smem>>
    %c1_237 = arith.constant 1 : index
    %c0_238 = arith.constant 0 : index
    %c0_239 = arith.constant 0 : index
    %c144_240 = arith.constant 144 : index
    %329 = vector.load %arg5[%c1_237, %c0_238, %c0_239, %c144_240] : memref<2x1x10x512xf32, #tpu.memory_space<vmem>>, vector<1x1x8x256xf32>
    %330 = vector.shape_cast %329 : vector<1x1x8x256xf32> to vector<1x8x256xf32>
    %331 = vector.broadcast %328 : f32 to vector<1x8x256xf32>
    %332 = arith.mulf %330, %331 : vector<1x8x256xf32>
    %333 = arith.addf %327, %332 : vector<1x8x256xf32>
    %c43 = arith.constant 43 : index
    %334 = memref.load %arg3[%c43] : memref<54xf32, #tpu.memory_space<smem>>
    %c1_241 = arith.constant 1 : index
    %c0_242 = arith.constant 0 : index
    %c1_243 = arith.constant 1 : index
    %c144_244 = arith.constant 144 : index
    %335 = vector.load %arg5[%c1_241, %c0_242, %c1_243, %c144_244] : memref<2x1x10x512xf32, #tpu.memory_space<vmem>>, vector<1x1x8x256xf32>
    %336 = vector.shape_cast %335 : vector<1x1x8x256xf32> to vector<1x8x256xf32>
    %337 = vector.broadcast %334 : f32 to vector<1x8x256xf32>
    %338 = arith.mulf %336, %337 : vector<1x8x256xf32>
    %339 = arith.addf %333, %338 : vector<1x8x256xf32>
    %c52 = arith.constant 52 : index
    %340 = memref.load %arg3[%c52] : memref<54xf32, #tpu.memory_space<smem>>
    %c1_245 = arith.constant 1 : index
    %c0_246 = arith.constant 0 : index
    %c2_247 = arith.constant 2 : index
    %c144_248 = arith.constant 144 : index
    %341 = vector.load %arg5[%c1_245, %c0_246, %c2_247, %c144_248] : memref<2x1x10x512xf32, #tpu.memory_space<vmem>>, vector<1x1x8x256xf32>
    %342 = vector.shape_cast %341 : vector<1x1x8x256xf32> to vector<1x8x256xf32>
    %343 = vector.broadcast %340 : f32 to vector<1x8x256xf32>
    %344 = arith.mulf %342, %343 : vector<1x8x256xf32>
    %345 = arith.addf %339, %344 : vector<1x8x256xf32>
    %c7_249 = arith.constant 7 : index
    %c0_250 = arith.constant 0 : index
    %c0_251 = arith.constant 0 : index
    %346 = vector.load %arg2[%c7_249, %c0_250, %c0_251] : memref<9x8x256xf32, #tpu.memory_space<vmem>>, vector<1x8x256xf32>
    %347 = vector.shape_cast %346 : vector<1x8x256xf32> to vector<8x256xf32>
    %348 = vector.shape_cast %347 : vector<8x256xf32> to vector<1x8x256xf32>
    %349 = arith.mulf %345, %348 : vector<1x8x256xf32>
    %350 = arith.addf %310, %349 : vector<1x8x256xf32>
    %c8 = arith.constant 8 : index
    %351 = memref.load %arg3[%c8] : memref<54xf32, #tpu.memory_space<smem>>
    %c0_252 = arith.constant 0 : index
    %c0_253 = arith.constant 0 : index
    %c0_254 = arith.constant 0 : index
    %c145 = arith.constant 145 : index
    %352 = vector.load %arg5[%c0_252, %c0_253, %c0_254, %c145] : memref<2x1x10x512xf32, #tpu.memory_space<vmem>>, vector<1x1x8x256xf32>
    %353 = vector.shape_cast %352 : vector<1x1x8x256xf32> to vector<1x8x256xf32>
    %354 = vector.broadcast %351 : f32 to vector<1x8x256xf32>
    %355 = arith.mulf %353, %354 : vector<1x8x256xf32>
    %c17 = arith.constant 17 : index
    %356 = memref.load %arg3[%c17] : memref<54xf32, #tpu.memory_space<smem>>
    %c0_255 = arith.constant 0 : index
    %c0_256 = arith.constant 0 : index
    %c1_257 = arith.constant 1 : index
    %c145_258 = arith.constant 145 : index
    %357 = vector.load %arg5[%c0_255, %c0_256, %c1_257, %c145_258] : memref<2x1x10x512xf32, #tpu.memory_space<vmem>>, vector<1x1x8x256xf32>
    %358 = vector.shape_cast %357 : vector<1x1x8x256xf32> to vector<1x8x256xf32>
    %359 = vector.broadcast %356 : f32 to vector<1x8x256xf32>
    %360 = arith.mulf %358, %359 : vector<1x8x256xf32>
    %361 = arith.addf %355, %360 : vector<1x8x256xf32>
    %c26 = arith.constant 26 : index
    %362 = memref.load %arg3[%c26] : memref<54xf32, #tpu.memory_space<smem>>
    %c0_259 = arith.constant 0 : index
    %c0_260 = arith.constant 0 : index
    %c2_261 = arith.constant 2 : index
    %c145_262 = arith.constant 145 : index
    %363 = vector.load %arg5[%c0_259, %c0_260, %c2_261, %c145_262] : memref<2x1x10x512xf32, #tpu.memory_space<vmem>>, vector<1x1x8x256xf32>
    %364 = vector.shape_cast %363 : vector<1x1x8x256xf32> to vector<1x8x256xf32>
    %365 = vector.broadcast %362 : f32 to vector<1x8x256xf32>
    %366 = arith.mulf %364, %365 : vector<1x8x256xf32>
    %367 = arith.addf %361, %366 : vector<1x8x256xf32>
    %c35 = arith.constant 35 : index
    %368 = memref.load %arg3[%c35] : memref<54xf32, #tpu.memory_space<smem>>
    %c1_263 = arith.constant 1 : index
    %c0_264 = arith.constant 0 : index
    %c0_265 = arith.constant 0 : index
    %c145_266 = arith.constant 145 : index
    %369 = vector.load %arg5[%c1_263, %c0_264, %c0_265, %c145_266] : memref<2x1x10x512xf32, #tpu.memory_space<vmem>>, vector<1x1x8x256xf32>
    %370 = vector.shape_cast %369 : vector<1x1x8x256xf32> to vector<1x8x256xf32>
    %371 = vector.broadcast %368 : f32 to vector<1x8x256xf32>
    %372 = arith.mulf %370, %371 : vector<1x8x256xf32>
    %373 = arith.addf %367, %372 : vector<1x8x256xf32>
    %c44 = arith.constant 44 : index
    %374 = memref.load %arg3[%c44] : memref<54xf32, #tpu.memory_space<smem>>
    %c1_267 = arith.constant 1 : index
    %c0_268 = arith.constant 0 : index
    %c1_269 = arith.constant 1 : index
    %c145_270 = arith.constant 145 : index
    %375 = vector.load %arg5[%c1_267, %c0_268, %c1_269, %c145_270] : memref<2x1x10x512xf32, #tpu.memory_space<vmem>>, vector<1x1x8x256xf32>
    %376 = vector.shape_cast %375 : vector<1x1x8x256xf32> to vector<1x8x256xf32>
    %377 = vector.broadcast %374 : f32 to vector<1x8x256xf32>
    %378 = arith.mulf %376, %377 : vector<1x8x256xf32>
    %379 = arith.addf %373, %378 : vector<1x8x256xf32>
    %c53 = arith.constant 53 : index
    %380 = memref.load %arg3[%c53] : memref<54xf32, #tpu.memory_space<smem>>
    %c1_271 = arith.constant 1 : index
    %c0_272 = arith.constant 0 : index
    %c2_273 = arith.constant 2 : index
    %c145_274 = arith.constant 145 : index
    %381 = vector.load %arg5[%c1_271, %c0_272, %c2_273, %c145_274] : memref<2x1x10x512xf32, #tpu.memory_space<vmem>>, vector<1x1x8x256xf32>
    %382 = vector.shape_cast %381 : vector<1x1x8x256xf32> to vector<1x8x256xf32>
    %383 = vector.broadcast %380 : f32 to vector<1x8x256xf32>
    %384 = arith.mulf %382, %383 : vector<1x8x256xf32>
    %385 = arith.addf %379, %384 : vector<1x8x256xf32>
    %c8_275 = arith.constant 8 : index
    %c0_276 = arith.constant 0 : index
    %c0_277 = arith.constant 0 : index
    %386 = vector.load %arg2[%c8_275, %c0_276, %c0_277] : memref<9x8x256xf32, #tpu.memory_space<vmem>>, vector<1x8x256xf32>
    %387 = vector.shape_cast %386 : vector<1x8x256xf32> to vector<8x256xf32>
    %388 = vector.shape_cast %387 : vector<8x256xf32> to vector<1x8x256xf32>
    %389 = arith.mulf %385, %388 : vector<1x8x256xf32>
    %390 = arith.addf %350, %389 : vector<1x8x256xf32>
    %391 = arith.negf %390 : vector<1x8x256xf32>
    %392 = math.exp %391 : vector<1x8x256xf32>
    %cst_278 = arith.constant 1.000000e+00 : f32
    %393 = vector.broadcast %cst_278 : f32 to vector<1x8x256xf32>
    %394 = arith.addf %393, %392 : vector<1x8x256xf32>
    %395 = arith.divf %393, %394 : vector<1x8x256xf32>
    %c0_279 = arith.constant 0 : index
    %c0_280 = arith.constant 0 : index
    %c0_281 = arith.constant 0 : index
    %396 = vector.load %arg4[%c0_279, %c0_280, %c0_281] : memref<1x8x256xf32, #tpu.memory_space<vmem>>, vector<1x8x256xf32>
    tpu.vector_store %arg4[%c0_279, %c0_280, %c0_281], %395 {strides = array<i32>} : memref<1x8x256xf32, #tpu.memory_space<vmem>>, vector<1x8x256xf32>,
    return
  }
  func.func @transform_0(%arg0: i32) -> (i32, i32, i32, i32) {
    %c0_i32 = arith.constant 0 : i32
    %c0_i32_0 = arith.constant 0 : i32
    %c0_i32_1 = arith.constant 0 : i32
    %c0_i32_2 = arith.constant 0 : i32
    return %arg0, %c0_i32, %c0_i32_0, %c0_i32_1 : i32, i32, i32, i32
  }
  func.func @transform_1(%arg0: i32) -> (i32, i32, i32) {
    %c0_i32 = arith.constant 0 : i32
    %c0_i32_0 = arith.constant 0 : i32
    %c0_i32_1 = arith.constant 0 : i32
    %c0_i32_2 = arith.constant 0 : i32
    return %c0_i32, %c0_i32_0, %c0_i32_1 : i32, i32, i32
  }
  func.func @transform_2(%arg0: i32) -> i32 {
    %c0_i32 = arith.constant 0 : i32
    %c0_i32_0 = arith.constant 0 : i32
    return %c0_i32 : i32
  }
  func.func @transform_3(%arg0: i32) -> (i32, i32, i32) {
    %c0_i32 = arith.constant 0 : i32
    %c0_i32_0 = arith.constant 0 : i32
    %c0_i32_1 = arith.constant 0 : i32
    return %arg0, %c0_i32, %c0_i32_0 : i32, i32, i32
  }
}

</mosaic_0001>

<bundles_post_ra>
// kernel: spatial_attention.1
= control target key start
LH: loop header
LB: loop body
LE: loop exit
PB: predicated region body
PF: predicated region fallthrough
CT: control target
= control target key end

     0   :  { %8 = vsyncpa [#allocation4], 0  ;;  %s2087_s12 = smov 0   ;;  %s3120_s0 = inlined_call_operand.vmem [shape: f32[2,4,8,256], index: 0, kind: input, shape index: {}]   ;;  %s3121_s1 = inlined_call_operand.vmem [shape: f32[9,8,256], index: 1, kind: input, shape index: {}]   ;;  %s3122_s2 = inlined_call_operand.vmem [shape: f32[54], index: 2, kind: input, shape index: {}]   ;;  %s3123_s3 = inlined_call_operand.vmem [shape: f32[2,8,256], index: 3, kind: output, shape index: {}]  }
   0x1 LB: > { %s1858_s13 = sadd.s32 4294967295, %s2050_s12   ;;  %p1860_p0 = scmp.ge.s32.totalorder %s2050_s12, 1  ;;  %s2050_s12 = sphi %s2087_s12, %s14_s12  }
   0x2   : > { %p113_p1 = scmp.lt.s32.totalorder %s2050_s12, 3  ;;  %s128_s16 = sshll.u32 %s3122_s2, 4  ;;  %s129_s16 = int_to_ptr.vmem [resolvable:$true] %s128_s16 }
   0x3   : > { %p1959_p3 = scmp.eq.s32.totalorder %s1858_s13, 0  ;;  %s2052_s17 = smov [#allocation3]  }
   0x4   : > { %p114_p2 = pnand %p1860_p0, %p113_p1 }
   0x6   : > { %p1955_p4 = pneg %p114_p2  ;;  %149 = sbr.rel (%p114_p2) target bundleno = 518 (0x206), region = 32 }
   0x8   : > { %p1956_p5 = pnand %p1959_p3, %p1955_p4 }
   0xa   : > { %1958 = dma.vmem_to_smem (!%p1956_p5), %s129_s16, 16, %s2052_s17, [#allocation4]  }
   0xb   : > { %2045 = dma.done.wait (%p1959_p3), [#allocation4], 16  }
   0xc   : > { %2047 = vsyncadd (%p1959_p3), [#allocation4], 4294967280 }
   0xd   : > { %156 = sfence }
   0xe   : > { %v1894_v0 = vld [vmem:[%s3121_s1 + $0x20] sm:$0xff]  ;;  %v1886_v1 = vld [vmem:[%s3121_s1 + $0x10] sm:$0xff]  ;;  %s2053_s22 = smov 113   ;;  %s2054_s23 = smov 112   ;;  %v193_v2 = vlaneseq  ;;  %v2056_v4 = vmov 0.0   ;;  %v1895_v5 = vld [vmem:[%s3121_s1 + $0x28] sm:$0xff] }
   0xf   : > { %733 = vrot.lane.b32.xlu1 %v1894_v0, %s2053_s22  ;;  %569 = vrot.lane.b32.xlu0 %v1886_v1, %s2054_s23  ;;  %v1902_v3 = vld [vmem:[%s3121_s1 + $0x30] sm:$0xff]  ;;  %s2055_s26 = smov 127   ;;  %p175_p6 = scmp.lt.s32.totalorder %s1858_s13, 1  ;;  %v1887_v6 = vld [vmem:[%s3121_s1 + $0x18] sm:$0xff]  ;;  %185 = vst [vmem:[#allocation2] sm:$0xff] %v2056_v4  ;;  %vm283_vm1 = vcmask 1046528  }
  0x10   : > { %897 = vrot.lane.b32.xlu2 %v1902_v3, %s2055_s26  ;;  %vm195_vm0 = vcmp.lt.s32.totalorder %v193_v2, 256  ;;  %v1903_v7 = vld [vmem:[%s3121_s1 + $0x38] sm:$0xff]  ;;  %186 = vst [vmem:[#allocation2 + $0x20] sm:$0x3] %v2056_v4  ;;  %v1918_v17 = vld [vmem:[%s3121_s1 + $0x50] sm:$0xff]  ;;  %v1926_v20 = vld [vmem:[%s3121_s1 + $0x60] sm:$0xff] }
  0x11   : > { %198 = vst.msk [vmem:[#allocation2 + $0x8] ss:$8 sm:$0x3] %vm195_vm0, %v2056_v4  ;;  %s3137_s13 = smov (!%p175_p6, %s1858_s13), 1  ;;  %v1919_v16 = vld [vmem:[%s3121_s1 + $0x58] sm:$0xff]  ;;  %s1905_s18 = sld [smem:[#allocation3 + $0xd]] }
  0x12   : > { %201 = vst.msk [vmem:[#allocation2 + $0x48] ss:$8 sm:$0x3] %vm195_vm0, %v2056_v4  ;;  %s1949_s4 = sshll.u32 %s3137_s13, 6  ;;  %s2057_s19 = smov 1   ;;  %v1927_v24 = vld [vmem:[%s3121_s1 + $0x68] sm:$0xff] }
  0x13   : > { %204 = vst.msk [vmem:[#allocation2 + $0x29] ss:$8 sm:$0x3] %vm195_vm0, %v2056_v4  ;;  %s2124_s9 = scalar_lea.vmem %s3120_s0, %s1949_s4  ;;  %s1906_s20 = sld [smem:[#allocation3 + $0x16]]  ;;  %v1934_v25 = vld [vmem:[%s3121_s1 + $0x70] sm:$0xff]  ;;  %v1935_v26 = vld [vmem:[%s3121_s1 + $0x78] sm:$0xff] }
  0x14   : > { %207 = vst.msk [vmem:[#allocation2 + $0x69] ss:$8 sm:$0x3] %vm195_vm0, %v2056_v4  ;;  %v209_v8 = vld [vmem:[%s2124_s9] sm:$0xff]  ;;  %v1869_v9 = vld [vmem:[%s2124_s9 + $0x10] sm:$0xff]  ;;  %s1908_s21 = sld [smem:[#allocation3 + $0x28]] }
  0x15   : > { %v214_v10 = vadd.f32 %v1869_v9, %v209_v8  ;;  %v216_v11 = vmax.f32 %v209_v8, %v1869_v9  ;;  %v1871_v12 = vld [vmem:[%s2124_s9 + $0x20] sm:$0xff]  ;;  %187 = vst [vmem:[#allocation2 + $0x40] sm:$0xff] %v2056_v4  ;;  %v1873_v13 = vld [vmem:[%s2124_s9 + $0x30] sm:$0xff]  ;;  %s2141_s24 = sld [smem:[#allocation3 + $0x4]]  ;;  %s2059_s7 = smov 16   ;;  %vm319_vm2 = vcmask 1045504  }
  0x16   : > { %188 = vst [vmem:[#allocation2 + $0x60] sm:$0x3] %v2056_v4  ;;  %s1909_s25 = sld [smem:[#allocation3 + $0x31]]  ;;  %v1943_v47 = vld [vmem:[%s3121_s1 + $0x88] sm:$0xff]  ;;  %v1942_v48 = vld [vmem:[%s3121_s1 + $0x80] sm:$0xff]  ;;  %s2060_s15 = smov 17  }
  0x17   : > { %735 = vrot.lane.b32.xlu1 %v1895_v5, %s2053_s22  ;;  %571 = vrot.lane.b32.xlu0 %v1887_v6, %s2054_s23  ;;  %v221_v14 = vadd.f32 %v1871_v12, %v214_v10  ;;  %v223_v15 = vmax.f32 %v216_v11, %v1871_v12  ;;  %189 = vst [vmem:[#allocation2 + $0x18] sm:$0xff] %v2056_v4  ;;  %s2058_s22 = smov 15   ;;  %s2149_s4 = sld [smem:[#allocation3 + $0x1f]]  ;;  %v2154_v27 = vstv %s1905_s18  ;;  %v210_v10 = vld [vmem:[%s2124_s9 + $0x8] sm:$0xff]  ;;  %vm737_vm3 = vcmask 924672  }
  0x18   : > { %899 = vrot.lane.b32.xlu2 %v1903_v7, %s2055_s26  ;;  %190 = vst [vmem:[#allocation2 + $0x38] sm:$0x3] %v2056_v4  ;;  %v1910_v7 = vld [vmem:[%s3121_s1 + $0x40] sm:$0xff]  ;;  %s2061_s18 = smov 111   ;;  %v1870_v11 = vld [vmem:[%s2124_s9 + $0x18] sm:$0xff]  ;;  %s2230_s27 = sld [smem:[#allocation3 + $0x1c]] }
  0x19   : > { %v228_v18 = vadd.f32 %v1873_v13, %v221_v14  ;;  %v230_v19 = vmax.f32 %v223_v15, %v1873_v13  ;;  %191 = vst [vmem:[#allocation2 + $0x58] sm:$0xff] %v2056_v4  ;;  %v2156_v28 = vstv %s1906_s20  ;;  %v215_v12 = vadd.f32 %v1870_v11, %v210_v10  ;;  %v1872_v13 = vld [vmem:[%s2124_s9 + $0x28] sm:$0xff]  ;;  %s1882_s20 = sld [smem:[#allocation3 + $0x13]]  ;;  %v1874_v15 = vld [vmem:[%s2124_s9 + $0x38] sm:$0xff] }
  0x1a   : > { %192 = vst [vmem:[#allocation2 + $0x78] sm:$0x3] %v2056_v4  ;;  %v2164_v32 = vstv %s1908_s21  ;;  %s1880_s21 = sld [smem:[#allocation3 + $0x1]]  ;;  %vm573_vm4 = vcmask 916480   ;;  %vm590_vm5 = vcmask 1039360   ;;  %vm1201_vm6 = vcmask 7168  }
  0x1b   : > { %v232_v21 = vmul.f32 0.25, %v228_v18  ;;  %v246_v22 = vrot.slane %v230_v19, 7  ;;  %v3125_v36 = vstv %s2141_s24  ;;  %v222_v14 = vadd.f32 %v1872_v13, %v215_v12  ;;  %s2238_s28 = sld [smem:[#allocation3 + $0x2e]] }
  0x1c   : > { %v2183_v42 = vstv %s1909_s25  ;;  %s2228_s25 = sld [smem:[#allocation3 + $0x25]]  ;;  %v217_v18 = vmax.f32 %v210_v10, %v1870_v11  ;;  %vm1365_vm7 = vcmask 121856   ;;  %vm1529_vm8 = vcmask 130048  }
  0x1d   : > { %v236_v23 = vrot.slane %v232_v21, 7  ;;  %251 = vst [vmem:[#allocation2 + $0x48] sm:$0xfe] %v246_v22  ;;  %v3124_v52 = vstv %s2149_s4  ;;  %v2234_v21 = vld [vmem:[#allocation2 + $0x20] sm:$0x1]  ;;  %s2240_s9 = sld [smem:[#allocation3 + $0x14]] }
  0x1e   : > { %253 = vst [vmem:[#allocation2 + $0x68] sm:$0x1] %v246_v22  ;;  %s2252_s29 = sld [smem:[#allocation3 + $0x2]]  ;;  %vm1693_vm9 = vcmask 138240   ;;  %vm424_vm10 = vcmask 908288   ;;  %vm754_vm11 = vcmask 1031168  }
  0x1f   : > { %1199 = vrot.lane.b32.xlu1 %v1919_v16, %s2057_s19  ;;  %1197 = vrot.lane.b32.xlu0 %v1918_v17, %s2057_s19  ;;  %240 = vst [vmem:[#allocation2 + $0x8] sm:$0xfe] %v236_v23  ;;  %s1881_s19 = sld [smem:[#allocation3 + $0xa]]  ;;  %v229_v16 = vadd.f32 %v1874_v15, %v222_v14  ;;  %vm1218_vm12 = vcmask 900096   ;;  %vm1382_vm13 = vcmask 785408   ;;  %vm1546_vm14 = vcmask 777216  }
  0x20   : > { %1361 = vrot.lane.b32.xlu2 %v1926_v20, %s2058_s22  ;;  %242 = vst [vmem:[#allocation2 + $0x28] sm:$0x1] %v236_v23  ;;  %v2232_v20 = vld [vmem:[#allocation2] sm:$0xfe]  ;;  %s2258_s30 = sld [smem:[#allocation3 + $0x1d]]  ;;  %vm1710_vm15 = vcmask 769024  }
  0x21   : > { %v233_v17 = vmul.f32 0.25, %v229_v16  ;;  %s2263_s5 = sld [smem:[#allocation3 + $0x26]] }
  0x22   : > { %s2273_s6 = sld [smem:[#allocation3 + $0x2f]] }
  0x23   : > { %v237_v19 = vrot.slane %v233_v17, 7  ;;  %s2355_s14 = sld [smem:[#allocation3 + $0x3]] }
  0x24   : > { %v2158_v29 = vld [vmem:[#allocation2 + $0x48] sm:$0xfe]  ;;  %s2363_s16 = sld [smem:[#allocation3 + $0xc]] }
  0x25   : > { %v2160_v30 = vld [vmem:[#allocation2 + $0x68] sm:$0x1]  ;;  %v2162_v31 = vld [vmem:[#allocation2 + $0x48] sm:$0xfc]  ;;  %v977_v45 = vmul.f32 %v2164_v32, %v2158_v29  ;;  %v2236_v22 = vstv %s1881_s19  ;;  %241 = vst [vmem:[#allocation2 + $0x10] sm:$0xfe] %v237_v19 }
  0x26   : > { %v2166_v33 = vld [vmem:[#allocation2 + $0x8] sm:$0xff]  ;;  %v979_v46 = vmul.f32 %v2164_v32, %v2160_v30  ;;  %v997_v56 = vmul.f32 %v2183_v42, %v2162_v31  ;;  %v442_v23 = vmul.f32 %v2236_v22, %v2232_v20  ;;  %243 = vst [vmem:[#allocation2 + $0x30] sm:$0x1] %v237_v19  ;;  %s2367_s17 = sld [smem:[#allocation3 + $0x15]] }
  0x27   : > { %1363 = vrot.lane.b32.xlu0 %v1927_v24, %s2058_s22  ;;  %1525 = vrot.lane.b32.xlu1 %v1934_v25, %s2059_s7  ;;  %v2168_v34 = vld [vmem:[#allocation2 + $0x8] sm:$0xfe]  ;;  %v2173_v37 = vld [vmem:[#allocation2 + $0x28] sm:$0x1]  ;;  %v927_v49 = vmul.f32 %v3125_v36, %v2166_v33  ;;  %v985_v60 = vrot.slane %v977_v45, 1  ;;  %s2226_s22 = sld [smem:[#allocation3 + $0xb]]  ;;  %v445_v24 = vmul.f32 %v2236_v22, %v2234_v21  ;;  %v224_v25 = vmax.f32 %v217_v18, %v1872_v13 }
  0x28   : > { %1527 = vrot.lane.b32.xlu2 %v1935_v26, %s2059_s7  ;;  %v2170_v35 = vld [vmem:[#allocation2 + $0x8] sm:$0xfc]  ;;  %v2175_v38 = vld [vmem:[#allocation2 + $0x28] sm:$0x3]  ;;  %v931_v40 = vmul.f32 %v2154_v27, %v2168_v34  ;;  %v933_v43 = vmul.f32 %v2154_v27, %v2173_v37  ;;  %v986_v61 = vrot.slane %v979_v46, 1  ;;  %v1005_v0 = vrot.slane %v997_v56, 2 }
  0x29   : > { %v2177_v39 = vld [vmem:[#allocation2 + $0x68] sm:$0x3]  ;;  %v951_v41 = vmul.f32 %v2156_v28, %v2170_v35  ;;  %v953_v44 = vmul.f32 %v2156_v28, %v2175_v38  ;;  %v2246_v26 = vld [vmem:[#allocation2] sm:$0xfc]  ;;  %v455_v45 = vrot.slane %v445_v24, 1  ;;  %v600_v13 = vstv %s2252_s29  ;;  %s2373_s19 = sld [smem:[#allocation3 + $0x1e]] }
  0x2a   : > { %v939_v50 = vrot.slane %v931_v40, 1  ;;  %v2203_v53 = vld [vmem:[#allocation2 + $0x48] sm:$0xff]  ;;  %v940_v54 = vrot.slane %v933_v43, 1  ;;  %v999_v57 = vmul.f32 %v2183_v42, %v2177_v39  ;;  %v987_v3 = vsel %vm283_vm1, %v985_v60, %v986_v61  ;;  %v2248_v40 = vld [vmem:[#allocation2 + $0x20] sm:$0x3]  ;;  %s2062_s29 = smov 126  }
  0x2b   : > { %v959_v51 = vrot.slane %v951_v41, 2  ;;  %v960_v55 = vrot.slane %v953_v44, 2  ;;  %v971_v63 = vmul.f32 %v3124_v52, %v2203_v53  ;;  %v2250_v41 = vstv %s1882_s20  ;;  %s2379_s20 = sld [smem:[#allocation3 + $0x27]] }
  0x2c   : > { %v941_v58 = vsel %vm283_vm1, %v939_v50, %v940_v54  ;;  %v1006_v1 = vrot.slane %v999_v57, 2  ;;  %v2254_v43 = vstv %s1880_s21  ;;  %v454_v44 = vrot.slane %v442_v23, 1  ;;  %v2266_v54 = vld [vmem:[#allocation2 + $0x40] sm:$0xfe]  ;;  %s2388_s21 = sld [smem:[#allocation3 + $0x30]] }
  0x2d   : > { %v961_v59 = vsel %vm319_vm2, %v959_v51, %v960_v55  ;;  %v947_v62 = vadd.f32 %v941_v58, %v927_v49  ;;  %v471_v46 = vmul.f32 %v2250_v41, %v2246_v26  ;;  %v231_v49 = vmax.f32 %v224_v25, %v1874_v15  ;;  %v2268_v55 = vld [vmem:[#allocation2 + $0x60] sm:$0x1]  ;;  %s2724_s7 = sld [smem:[#allocation3 + $0x18]] }
  0x2e   : > { %v1007_v5 = vsel %vm319_vm2, %v1005_v0, %v1006_v1  ;;  %v456_v50 = vsel %vm283_vm1, %v454_v44, %v455_v45  ;;  %v2271_v58 = vstv %s2228_s25  ;;  %v2276_v60 = vstv %s2230_s27  ;;  %v2284_v0 = vld [vmem:[#allocation2 + $0x60] sm:$0x3]  ;;  %s2515_s25 = sld [smem:[#allocation3 + $0xe]] }
  0x2f   : > { %1691 = vrot.lane.b32.xlu1 %v1943_v47, %s2060_s15  ;;  %1689 = vrot.lane.b32.xlu0 %v1942_v48, %s2060_s15  ;;  %v967_v2 = vadd.f32 %v961_v59, %v947_v62  ;;  %v437_v47 = vmul.f32 0.0, %v2254_v43  ;;  %v474_v48 = vmul.f32 %v2250_v41, %v2248_v40  ;;  %v483_v51 = vrot.slane %v471_v46, 2  ;;  %s2521_s27 = sld [smem:[#allocation3 + $0x17]] }
  0x30   : > { %v247_v59 = vrot.slane %v231_v49, 7  ;;  %v508_v61 = vmul.f32 %v2271_v58, %v2266_v54  ;;  %v511_v62 = vmul.f32 %v2271_v58, %v2268_v55  ;;  %v605_v1 = vstv %s2226_s22  ;;  %s2506_s22 = sld [smem:[#allocation3 + $0x5]] }
  0x31   : > { %v973_v4 = vadd.f32 %v971_v63, %v967_v2  ;;  %v466_v56 = vadd.f32 %v456_v50, %v437_v47  ;;  %v484_v57 = vrot.slane %v474_v48, 2  ;;  %v2282_v63 = vld [vmem:[#allocation2 + $0x40] sm:$0xfc]  ;;  %v601_v17 = vmul.f32 0.0, %v600_v13  ;;  %s2742_s8 = sld [smem:[#allocation3 + $0x21]] }
  0x32   : > { %252 = vst [vmem:[#allocation2 + $0x50] sm:$0xfe] %v247_v59  ;;  %v521_v10 = vrot.slane %v511_v62, 1  ;;  %v2309_v48 = vstv %s2263_s5  ;;  %v663_v50 = vstv %s2258_s30  ;;  %v2416_v52 = vstv %s2363_s16  ;;  %s2710_s5 = sld [smem:[#allocation3 + $0x6]] }
  0x33   : > { %v993_v6 = vadd.f32 %v987_v3, %v973_v4  ;;  %v485_v2 = vsel %vm319_vm2, %v483_v51, %v484_v57  ;;  %v500_v3 = vmul.f32 0.0, %v2276_v60  ;;  %v2290_v4 = vstv %s2238_s28  ;;  %254 = vst [vmem:[#allocation2 + $0x70] sm:$0x1] %v247_v59  ;;  %v417_v59 = vld [vmem:[%s3121_s1 + $0x8] sm:$0xff]  ;;  %s2532_s28 = sld [smem:[#allocation3 + $0x29]] }
  0x34   : > { %v537_v11 = vmul.f32 %v2290_v4, %v2282_v63  ;;  %v540_v12 = vmul.f32 %v2290_v4, %v2284_v0  ;;  %v672_v51 = vmul.f32 %v2309_v48, %v2266_v54  ;;  %v2317_v57 = vstv %s2273_s6  ;;  %s2716_s6 = sld [smem:[#allocation3 + $0xf]] }
  0x35   : > { %v1013_v8 = vadd.f32 %v1007_v5, %v993_v6  ;;  %v606_v5 = vmul.f32 %v605_v1, %v2232_v20  ;;  %v609_v6 = vmul.f32 %v605_v1, %v2234_v21  ;;  %v664_v62 = vmul.f32 0.0, %v663_v50  ;;  %s2757_s10 = sld [smem:[#allocation3 + $0x2a]] }
  0x36   : > { %v549_v44 = vrot.slane %v537_v11, 2  ;;  %v550_v45 = vrot.slane %v540_v12, 2  ;;  %s2767_s11 = sld [smem:[#allocation3 + $0x33]] }
  0x37   : > { %v1018_v9 = vmul.f32 %v1910_v7, %v1013_v8  ;;  %v495_v7 = vadd.f32 %v485_v2, %v466_v56  ;;  %v520_v8 = vrot.slane %v508_v61, 1  ;;  %v618_v14 = vrot.slane %v606_v5, 1  ;;  %422 = vrot.lane.b32.xlu0 %v417_v59, %s2061_s18  ;;  %v416_v5 = vld [vmem:[%s3121_s1] sm:$0xff]  ;;  %v2357_v59 = vld [vmem:[#allocation2 + $0x30] sm:$0x3]  ;;  %s2829_s16 = sld [smem:[#allocation3 + $0x7]] }
  0x38   : > { %v619_v15 = vrot.slane %v609_v6, 1  ;;  %v675_v56 = vmul.f32 %v2309_v48, %v2268_v55  ;;  %v701_v2 = vmul.f32 %v2317_v57, %v2282_v63  ;;  %420 = vrot.lane.b32.xlu2 %v416_v5, %s2061_s18  ;;  %s1876_s30 = sld [smem:[#allocation3 + $0x12]] }
  0x39   : > { %1022 = vrot.lane.b32.xlu1 %v1018_v9, %s2061_s18  ;;  %v2295_v9 = vstv %s2240_s9  ;;  %v503_v19 = vadd.f32 %v500_v3, %v495_v7  ;;  %v522_v23 = vsel %vm283_vm1, %v520_v8, %v521_v10  ;;  %v704_v3 = vmul.f32 %v2317_v57, %v2284_v0  ;;  %s2539_s9 = sld [smem:[#allocation3 + $0x32]] }
  0x3a   : > { %v635_v16 = vmul.f32 %v2295_v9, %v2246_v26  ;;  %v638_v18 = vmul.f32 %v2295_v9, %v2248_v40  ;;  %v620_v24 = vsel %vm283_vm1, %v618_v14, %v619_v15  ;;  %v684_v7 = vrot.slane %v672_v51, 1 }
  0x3b   : > { %v630_v46 = vadd.f32 %v620_v24, %v601_v17  ;;  %v532_v49 = vadd.f32 %v522_v23, %v503_v19  ;;  %v685_v8 = vrot.slane %v675_v56, 1  ;;  %v551_v10 = vsel %vm319_vm2, %v549_v44, %v550_v45  ;;  %v2336_v17 = vld [vmem:[#allocation2 + $0x10] sm:$0xfe]  ;;  %v2344_v24 = vld [vmem:[#allocation2 + $0x30] sm:$0x1] }
  0x3c   : > { %v647_v25 = vrot.slane %v635_v16, 2  ;;  %v648_v47 = vrot.slane %v638_v18, 2  ;;  %v713_v11 = vrot.slane %v701_v2, 2  ;;  %v714_v12 = vrot.slane %v704_v3, 2  ;;  %v2342_v23 = vld [vmem:[#allocation2 + $0x10] sm:$0xff] }
  0x3d   : > { %v686_v15 = vsel %vm283_vm1, %v684_v7, %v685_v8  ;;  %v2334_v16 = vadd.f32 %v551_v10, %v532_v49  ;;  %v607_v18 = vmul.f32 %v605_v1, %v2168_v34  ;;  %v608_v44 = vmul.f32 %v605_v1, %v2336_v17  ;;  %v2369_v7 = vld [vmem:[#allocation2 + $0x50] sm:$0xff] }
  0x3e   : > { %v649_v61 = vsel %vm319_vm2, %v647_v25, %v648_v47  ;;  %v2340_v19 = vsel %vm319_vm2, %v713_v11, %v714_v12  ;;  %v602_v25 = vmul.f32 %v600_v13, %v2166_v33  ;;  %v610_v45 = vmul.f32 %v605_v1, %v2173_v37 }
  0x3f   : > { %v659_v6 = vadd.f32 %v649_v61, %v630_v46  ;;  %v2349_v46 = vld [vmem:[#allocation2 + $0x10] sm:$0xfc]  ;;  %v603_v47 = vmul.f32 %v600_v13, %v2342_v23  ;;  %v611_v49 = vmul.f32 %v605_v1, %v2344_v24  ;;  %v621_v51 = vrot.slane %v607_v18, 1 }
  0x40   : > { %v636_v56 = vmul.f32 %v2295_v9, %v2170_v35  ;;  %v622_v61 = vrot.slane %v610_v45, 1  ;;  %v637_v2 = vmul.f32 %v2295_v9, %v2349_v46  ;;  %v639_v3 = vmul.f32 %v2295_v9, %v2175_v38  ;;  %v2375_v18 = vld [vmem:[#allocation2 + $0x50] sm:$0xfe]  ;;  %v2381_v45 = vld [vmem:[#allocation2 + $0x70] sm:$0x1] }
  0x41   : > { %v667_v14 = vadd.f32 %v664_v62, %v659_v6  ;;  %v624_v62 = vrot.slane %v608_v44, 1  ;;  %v625_v1 = vrot.slane %v611_v49, 1  ;;  %v640_v5 = vmul.f32 %v2295_v9, %v2357_v59 }
  0x42   : > { %v650_v6 = vrot.slane %v636_v56, 2  ;;  %v623_v8 = vsel %vm283_vm1, %v621_v51, %v622_v61  ;;  %v651_v10 = vrot.slane %v639_v3, 2  ;;  %v653_v11 = vrot.slane %v637_v2, 2 }
  0x43   : > { %v696_v13 = vadd.f32 %v686_v15, %v667_v14  ;;  %v665_v12 = vmul.f32 %v663_v50, %v2203_v53  ;;  %v626_v14 = vsel %vm283_vm1, %v624_v62, %v625_v1  ;;  %v631_v15 = vadd.f32 %v623_v8, %v602_v25  ;;  %v2399_v8 = vld [vmem:[#allocation2 + $0x70] sm:$0x3] }
  0x44   : > { %v654_v44 = vrot.slane %v640_v5, 2  ;;  %v666_v9 = vmul.f32 %v663_v50, %v2369_v7  ;;  %v632_v49 = vadd.f32 %v626_v14, %v603_v47  ;;  %v652_v51 = vsel %vm319_vm2, %v650_v6, %v651_v10  ;;  %v2395_v47 = vld [vmem:[#allocation2 + $0x50] sm:$0xfc] }
  0x45   : > { %v673_v56 = vmul.f32 %v2309_v48, %v2158_v29  ;;  %v674_v61 = vmul.f32 %v2309_v48, %v2375_v18  ;;  %v660_v62 = vadd.f32 %v652_v51, %v631_v15  ;;  %v676_v50 = vmul.f32 %v2309_v48, %v2160_v30 }
  0x46   : > { %v655_v25 = vsel %vm319_vm2, %v653_v11, %v654_v44  ;;  %v677_v2 = vmul.f32 %v2309_v48, %v2381_v45  ;;  %v702_v6 = vmul.f32 %v2317_v57, %v2162_v31  ;;  %v703_v15 = vmul.f32 %v2317_v57, %v2395_v47 }
  0x47   : > { %v661_v3 = vadd.f32 %v655_v25, %v632_v49  ;;  %v687_v1 = vrot.slane %v673_v56, 1  ;;  %v690_v5 = vrot.slane %v674_v61, 1  ;;  %v668_v10 = vadd.f32 %v665_v12, %v660_v62 }
  0x48   : > { %v688_v11 = vrot.slane %v676_v50, 1  ;;  %v691_v14 = vrot.slane %v677_v2, 1  ;;  %v705_v44 = vmul.f32 %v2317_v57, %v2177_v39  ;;  %v706_v49 = vmul.f32 %v2317_v57, %v2399_v8 }
  0x49   : > { %v669_v48 = vadd.f32 %v666_v9, %v661_v3  ;;  %v716_v51 = vrot.slane %v702_v6, 2  ;;  %v719_v61 = vrot.slane %v703_v15, 2  ;;  %v2410_v25 = vstv %s2355_s14  ;;  %s2825_s14 = sld [smem:[#allocation3 + $0x10]] }
  0x4a   : > { %v689_v12 = vsel %vm283_vm1, %v687_v1, %v688_v11  ;;  %v692_v56 = vsel %vm283_vm1, %v690_v5, %v691_v14  ;;  %v717_v2 = vrot.slane %v705_v44, 2  ;;  %v720_v9 = vrot.slane %v706_v49, 2 }
  0x4b   : > { %v697_v62 = vadd.f32 %v689_v12, %v668_v10  ;;  %v698_v50 = vadd.f32 %v692_v56, %v669_v48  ;;  %v2413_v3 = vadd.f32 %v2340_v19, %v696_v13  ;;  %v2419_v57 = vstv %s2367_s17  ;;  %s2832_s17 = sld [smem:[#allocation3 + $0x19]] }
  0x4c   : > { %v2422_v6 = vstv %s2379_s20  ;;  %v718_v1 = vsel %vm319_vm2, %v716_v51, %v717_v2  ;;  %v721_v5 = vsel %vm319_vm2, %v719_v61, %v720_v9  ;;  %v2427_v11 = vstv %s2373_s19  ;;  %s2837_s19 = sld [smem:[#allocation3 + $0x2b]] }
  0x4d   : > { %v2430_v14 = vstv %s2388_s21  ;;  %v2432_v10 = vadd.f32 %v718_v1, %v697_v62  ;;  %v765_v15 = vmul.f32 0.0, %v2410_v25  ;;  %v770_v19 = vmul.f32 %v2416_v52, %v2232_v20  ;;  %s2844_s20 = sld [smem:[#allocation3 + $0x22]] }
  0x4e   : > { %v773_v13 = vmul.f32 %v2416_v52, %v2234_v21  ;;  %v2439_v48 = vadd.f32 %v721_v5, %v698_v50  ;;  %v799_v44 = vmul.f32 %v2419_v57, %v2246_v26  ;;  %v802_v49 = vmul.f32 %v2419_v57, %v2248_v40  ;;  %s2849_s21 = sld [smem:[#allocation3 + $0x34]] }
  0x4f   : > { %v836_v51 = vmul.f32 %v2422_v6, %v2266_v54  ;;  %v782_v12 = vrot.slane %v770_v19, 1  ;;  %v839_v61 = vmul.f32 %v2422_v6, %v2268_v55  ;;  %v865_v20 = vmul.f32 %v2430_v14, %v2282_v63 }
  0x50   : > { %v783_v56 = vrot.slane %v773_v13, 1  ;;  %v811_v21 = vrot.slane %v799_v44, 2  ;;  %v812_v62 = vrot.slane %v802_v49, 2  ;;  %v868_v26 = vmul.f32 %v2430_v14, %v2284_v0 }
  0x51   : > { %v848_v50 = vrot.slane %v836_v51, 1  ;;  %v828_v40 = vmul.f32 0.0, %v2427_v11  ;;  %v849_v9 = vrot.slane %v839_v61, 1  ;;  %v877_v54 = vrot.slane %v865_v20, 2 }
  0x52   : > { %v784_v2 = vsel %vm283_vm1, %v782_v12, %v783_v56  ;;  %v813_v5 = vsel %vm319_vm2, %v811_v21, %v812_v62  ;;  %v878_v19 = vrot.slane %v868_v26, 2  ;;  %v438_v55 = vmul.f32 %v2254_v43, %v2166_v33 }
  0x53   : > { %v794_v1 = vadd.f32 %v784_v2, %v765_v15  ;;  %v850_v63 = vsel %vm283_vm1, %v848_v50, %v849_v9  ;;  %v439_v13 = vmul.f32 %v2254_v43, %v2342_v23  ;;  %v443_v0 = vmul.f32 %v2236_v22, %v2168_v34 }
  0x54   : > { %v444_v44 = vmul.f32 %v2236_v22, %v2336_v17  ;;  %v879_v15 = vsel %vm319_vm2, %v877_v54, %v878_v19  ;;  %v446_v51 = vmul.f32 %v2236_v22, %v2173_v37  ;;  %v447_v12 = vmul.f32 %v2236_v22, %v2344_v24 }
  0x55   : > { %v823_v49 = vadd.f32 %v813_v5, %v794_v1  ;;  %v457_v56 = vrot.slane %v443_v0, 1  ;;  %v472_v43 = vmul.f32 %v2250_v41, %v2170_v35  ;;  %v473_v20 = vmul.f32 %v2250_v41, %v2349_v46 }
  0x56   : > { %v460_v61 = vrot.slane %v444_v44, 1  ;;  %v458_v62 = vrot.slane %v446_v51, 1  ;;  %v461_v50 = vrot.slane %v447_v12, 1  ;;  %v475_v26 = vmul.f32 %v2250_v41, %v2175_v38 }
  0x57   : > { %v831_v21 = vadd.f32 %v828_v40, %v823_v49  ;;  %v476_v2 = vmul.f32 %v2250_v41, %v2357_v59  ;;  %v486_v22 = vrot.slane %v472_v43, 2  ;;  %v489_v9 = vrot.slane %v473_v20, 2 }
  0x58   : > { %v501_v54 = vmul.f32 %v2276_v60, %v2203_v53  ;;  %v459_v5 = vsel %vm283_vm1, %v457_v56, %v458_v62  ;;  %v462_v40 = vsel %vm283_vm1, %v460_v61, %v461_v50  ;;  %v487_v19 = vrot.slane %v475_v26, 2 }
  0x59   : > { %v860_v1 = vadd.f32 %v850_v63, %v831_v21  ;;  %v467_v49 = vadd.f32 %v459_v5, %v438_v55  ;;  %v468_v51 = vadd.f32 %v462_v40, %v439_v13  ;;  %v490_v12 = vrot.slane %v476_v2, 2 }
  0x5a   : > { %v502_v36 = vmul.f32 %v2276_v60, %v2369_v7  ;;  %v488_v63 = vsel %vm319_vm2, %v486_v22, %v487_v19  ;;  %v509_v55 = vmul.f32 %v2271_v58, %v2158_v29  ;;  %v510_v13 = vmul.f32 %v2271_v58, %v2375_v18 }
  0x5b   : > { %v889_v20 = vadd.f32 %v879_v15, %v860_v1  ;;  %v491_v56 = vsel %vm319_vm2, %v489_v9, %v490_v12  ;;  %v496_v61 = vadd.f32 %v488_v63, %v467_v49  ;;  %v513_v15 = vmul.f32 %v2271_v58, %v2381_v45 }
  0x5c   : > { %v523_v50 = vrot.slane %v509_v55, 1  ;;  %v526_v26 = vrot.slane %v510_v13, 1  ;;  %v538_v2 = vmul.f32 %v2290_v4, %v2162_v31  ;;  %v539_v5 = vmul.f32 %v2290_v4, %v2395_v47 }
  0x5d   : > { %v504_v62 = vadd.f32 %v501_v54, %v496_v61  ;;  %v527_v1 = vrot.slane %v513_v15, 1  ;;  %v541_v40 = vmul.f32 %v2290_v4, %v2177_v39  ;;  %v3128_v19 = vstv %s2141_s24  ;;  %s2523_s24 = sld [smem:[#allocation3 + $0x20]] }
  0x5e   : > { %v552_v54 = vrot.slane %v538_v2, 2  ;;  %v928_v49 = vmul.f32 %v3128_v19, %v2342_v23  ;;  %v555_v12 = vrot.slane %v539_v5, 2  ;;  %v934_v15 = vmul.f32 %v2154_v27, %v2344_v24 }
  0x5f   : > { %v553_v61 = vrot.slane %v541_v40, 2  ;;  %v980_v5 = vmul.f32 %v2164_v32, %v2381_v45 }
  0x6a   : > { %v2487_v21 = vpop.permute.xlu2 %897 }
  0x6b   : > { %v2496_v60 = vmul.f32 %v2487_v21, %v889_v20 }
  0x81   : > { %v734_v0 = vpop.permute.xlu1 %733  ;;  %v570_v44 = vpop.permute.xlu0 %569 }
  0x82   : > { %v742_v41 = vmul.f32 %v734_v0, %v2413_v3  ;;  %v578_v43 = vmul.f32 %v570_v44, %v2334_v16  ;;  %v497_v16 = vadd.f32 %v491_v56, %v468_v51  ;;  %v512_v3 = vmul.f32 %v2271_v58, %v2160_v30 }
  0x83   : > { %v542_v58 = vmul.f32 %v2290_v4, %v2399_v8  ;;  %v528_v51 = vsel %vm283_vm1, %v526_v26, %v527_v1  ;;  %v978_v1 = vmul.f32 %v2164_v32, %v2375_v18  ;;  %v2562_v32 = vstv %s2506_s22  ;;  %s2064_s22 = smov 96  }
  0x84   : > { %584 = vrot.lane.b32.xlu1 %v578_v43, %s2055_s26  ;;  %v505_v22 = vadd.f32 %v502_v36, %v497_v16  ;;  %v524_v9 = vrot.slane %v512_v3, 1  ;;  %v932_v43 = vmul.f32 %v2154_v27, %v2336_v17  ;;  %v954_v27 = vmul.f32 %v2156_v28, %v2357_v59 }
  0x85   : > { %v556_v55 = vrot.slane %v542_v58, 2 }
  0x86   : > { %v525_v36 = vsel %vm283_vm1, %v523_v50, %v524_v9  ;;  %v534_v4 = vadd.f32 %v528_v51, %v505_v22  ;;  %v554_v50 = vsel %vm319_vm2, %v552_v54, %v553_v61  ;;  %v942_v2 = vrot.slane %v932_v43, 1 }
  0x87   : > { %v533_v56 = vadd.f32 %v525_v36, %v504_v62  ;;  %v557_v26 = vsel %vm319_vm2, %v555_v12, %v556_v55  ;;  %v943_v22 = vrot.slane %v934_v15, 1  ;;  %v988_v36 = vrot.slane %v978_v1, 1 }
  0x88   : > { %v989_v51 = vrot.slane %v980_v5, 1  ;;  %v998_v12 = vmul.f32 %v2183_v42, %v2395_v47  ;;  %v1000_v43 = vmul.f32 %v2183_v42, %v2399_v8  ;;  %v2574_v61 = vstv %s2521_s27  ;;  %v2579_v42 = vld [vmem:[#allocation2 + $0x18] sm:$0xfc]  ;;  %s2924_s27 = sld [smem:[#allocation3 + $0x1a]] }
  0x89   : > { %v736_v20 = vpop.permute.xlu1 %735  ;;  %v572_v63 = vpop.permute.xlu0 %571  ;;  %v2577_v55 = vstv %s2523_s24  ;;  %v1086_v5 = vmul.f32 %v2574_v61, %v2579_v42  ;;  %s2930_s24 = sld [smem:[#allocation3 + $0x2c]] }
  0x8a   : > { %v738_v13 = vsel %vm737_vm3, %v734_v0, %v736_v20  ;;  %v2527_v16 = vmul.f32 %v736_v20, %v2439_v48  ;;  %v574_v3 = vsel %vm573_vm4, %v570_v44, %v572_v63  ;;  %v562_v48 = vadd.f32 %v554_v50, %v533_v56 }
  0x8b   : > { %v2535_v62 = vmul.f32 %v738_v13, %v2432_v10  ;;  %v563_v0 = vadd.f32 %v557_v26, %v534_v4  ;;  %v952_v44 = vmul.f32 %v2156_v28, %v2349_v46  ;;  %v3130_v10 = vstv %s2149_s4  ;;  %v2581_v13 = vld [vmem:[#allocation2 + $0x38] sm:$0x3]  ;;  %s1875_s4 = sld [smem:[#allocation3 + $0x9]] }
  0x8c   : > { %748 = vrot.lane.b32.xlu1 %v742_v41, %s2062_s29  ;;  %v972_v9 = vmul.f32 %v3130_v10, %v2369_v7  ;;  %v2553_v40 = vmul.f32 %v574_v3, %v562_v48  ;;  %v944_v41 = vsel %vm283_vm1, %v942_v2, %v943_v22  ;;  %v963_v28 = vrot.slane %v954_v27, 2  ;;  %v2586_v2 = vld [vmem:[#allocation2 + $0x58] sm:$0xfe]  ;;  %v2596_v27 = vld [vmem:[#allocation2 + $0x78] sm:$0x1] }
  0x8d   : > { %3129 = vst [vmem:[#allocation6_spill] sm:$0xff] %v2535_v62  ;;  %v580_v58 = vmul.f32 %v572_v63, %v563_v0  ;;  %v962_v54 = vrot.slane %v952_v44, 2  ;;  %v948_v19 = vadd.f32 %v944_v41, %v928_v49  ;;  %v2565_v20 = vstv %s2515_s25  ;;  %v2567_v63 = vld [vmem:[#allocation2 + $0x18] sm:$0xfe]  ;;  %v2569_v49 = vld [vmem:[#allocation2 + $0x38] sm:$0x1] }
  0x8e   : > { %3131 = vst [vmem:[#allocation7_spill] sm:$0xff] %v2553_v40  ;;  %v990_v4 = vsel %vm283_vm1, %v988_v36, %v989_v51  ;;  %v1008_v15 = vrot.slane %v998_v12, 2  ;;  %v1009_v50 = vrot.slane %v1000_v43, 2  ;;  %v2584_v26 = vstv %s2532_s28  ;;  %v2603_v41 = vld [vmem:[#allocation2 + $0x58] sm:$0xfc]  ;;  %s2921_s25 = sld [smem:[#allocation3 + $0x11]] }
  0x8f   : > { %588 = vrot.lane.b32.xlu0 %v580_v58, %s2055_s26  ;;  %v964_v56 = vsel %vm319_vm2, %v962_v54, %v963_v28  ;;  %v2589_v48 = vstv %s2539_s9  ;;  %v1040_v0 = vmul.f32 0.0, %v2562_v32  ;;  %v1051_v22 = vmul.f32 %v2565_v20, %v2567_v63  ;;  %v2605_v54 = vld [vmem:[#allocation2 + $0x78] sm:$0x3]  ;;  %s2937_s28 = sld [smem:[#allocation3 + $0x23]] }
  0x90   : > { %v968_v3 = vadd.f32 %v964_v56, %v948_v19  ;;  %v1054_v44 = vmul.f32 %v2565_v20, %v2569_v49  ;;  %v1010_v1 = vsel %vm319_vm2, %v1008_v15, %v1009_v50  ;;  %v1089_v58 = vmul.f32 %v2574_v61, %v2581_v13  ;;  %3132 = vst [vmem:[#allocation8_spill] sm:$0xff] %v2605_v54  ;;  %s2942_s9 = sld [smem:[#allocation3 + $0x35]] }
  0x91   : > { %v1067_v19 = vrot.slane %v1051_v22, 1  ;;  %v1118_v36 = vmul.f32 0.0, %v2577_v55  ;;  %v1102_v12 = vrot.slane %v1086_v5, 2  ;;  %v1135_v56 = vmul.f32 %v2584_v26, %v2596_v27 }
  0x92   : > { %v974_v10 = vadd.f32 %v972_v9, %v968_v3  ;;  %v1068_v28 = vrot.slane %v1054_v44, 1  ;;  %v1132_v9 = vmul.f32 %v2584_v26, %v2586_v2  ;;  %v1103_v43 = vrot.slane %v1089_v58, 2  ;;  %v1911_v3 = vld [vmem:[%s3121_s1 + $0x48] sm:$0xff] }
  0x93   : > { %v1167_v50 = vmul.f32 %v2589_v48, %v2603_v41  ;;  %v1170_v22 = vmul.f32 %v2589_v48, %v2605_v54  ;;  %v1149_v5 = vrot.slane %v1135_v56, 1  ;;  %v767_v54 = vmul.f32 %v2410_v25, %v2342_v23 }
  0x94   : > { %911 = vrot.lane.b32.xlu1 %v2496_v60, %s2054_s23  ;;  %v994_v51 = vadd.f32 %v990_v4, %v974_v10  ;;  %v1069_v15 = vsel %vm283_vm1, %v1067_v19, %v1068_v28  ;;  %v1148_v60 = vrot.slane %v1132_v9, 1  ;;  %v1104_v10 = vsel %vm319_vm2, %v1102_v12, %v1103_v43 }
  0x95   : > { %v1075_v4 = vadd.f32 %v1069_v15, %v1040_v0  ;;  %v1183_v58 = vrot.slane %v1167_v50, 2  ;;  %v1184_v62 = vrot.slane %v1170_v22, 2  ;;  %v766_v19 = vmul.f32 %v2410_v25, %v2166_v33  ;;  %v2648_v50 = vpop.permute.xlu1 %1199 }
  0x96   : > { %v1014_v44 = vadd.f32 %v1010_v1, %v994_v51  ;;  %v1150_v40 = vsel %vm283_vm1, %v1148_v60, %v1149_v5  ;;  %v771_v1 = vmul.f32 %v2416_v52, %v2168_v34  ;;  %v774_v51 = vmul.f32 %v2416_v52, %v2173_v37 }
  0x97   : > { %752 = vrot.lane.b32.xlu0 %v2527_v16, %s2062_s29  ;;  %v1110_v9 = vadd.f32 %v1104_v10, %v1075_v4  ;;  %v1185_v0 = vsel %vm319_vm2, %v1183_v58, %v1184_v62  ;;  %v772_v16 = vmul.f32 %v2416_v52, %v2336_v17  ;;  %v775_v43 = vmul.f32 %v2416_v52, %v2344_v24 }
  0x98   : > { %v1019_v28 = vmul.f32 %v1911_v3, %v1014_v44  ;;  %v800_v25 = vmul.f32 %v2419_v57, %v2170_v35  ;;  %v801_v62 = vmul.f32 %v2419_v57, %v2349_v46  ;;  %v785_v34 = vrot.slane %v771_v1, 1 }
  0x99   : > { %v1121_v12 = vadd.f32 %v1118_v36, %v1110_v9  ;;  %v786_v56 = vrot.slane %v774_v51, 1  ;;  %v788_v3 = vrot.slane %v772_v16, 1  ;;  %v803_v17 = vmul.f32 %v2419_v57, %v2175_v38 }
  0x9a   : > { %1024 = vrot.lane.b32.xlu2 %v1019_v28, %s2061_s18  ;;  %v789_v15 = vrot.slane %v775_v43, 1  ;;  %v804_v36 = vmul.f32 %v2419_v57, %v2357_v59  ;;  %v814_v60 = vrot.slane %v800_v25, 2  ;;  %v817_v24 = vrot.slane %v801_v62, 2  ;;  %s2063_s18 = smov 110   ;;  %v2676_v62 = vld [vmem:[#allocation2 + $0x8] sm:$0xfe] }
  0x9b   : > { %v1156_v37 = vadd.f32 %v1150_v40, %v1121_v12  ;;  %v787_v52 = vsel %vm283_vm1, %v785_v34, %v786_v56  ;;  %v815_v35 = vrot.slane %v803_v17, 2  ;;  %v829_v46 = vmul.f32 %v2427_v11, %v2203_v53  ;;  %v2684_v17 = vld [vmem:[#allocation2 + $0x28] sm:$0x1] }
  0x9c   : > { %v790_v44 = vsel %vm283_vm1, %v788_v3, %v789_v15  ;;  %v795_v4 = vadd.f32 %v787_v52, %v766_v19  ;;  %v818_v38 = vrot.slane %v804_v36, 2  ;;  %v830_v59 = vmul.f32 %v2427_v11, %v2369_v7  ;;  %v900_v11 = vpop.permute.xlu2 %899  ;;  %v2690_v36 = vld [vmem:[#allocation2 + $0x8] sm:$0xfc] }
  0x9d   : > { %v1191_v22 = vadd.f32 %v1185_v0, %v1156_v37  ;;  %v796_v40 = vadd.f32 %v790_v44, %v767_v54  ;;  %v816_v10 = vsel %vm319_vm2, %v814_v60, %v815_v35  ;;  %v837_v57 = vmul.f32 %v2422_v6, %v2158_v29 }
  0x9e   : > { %v819_v58 = vsel %vm319_vm2, %v817_v24, %v818_v38  ;;  %v824_v28 = vadd.f32 %v816_v10, %v795_v4  ;;  %v838_v53 = vmul.f32 %v2422_v6, %v2375_v18  ;;  %v840_v54 = vmul.f32 %v2422_v6, %v2160_v30  ;;  %v2699_v24 = vld [vmem:[#allocation2 + $0x10] sm:$0xfc]  ;;  %v2706_v4 = vld [vmem:[#allocation2 + $0x28] sm:$0x3] }
  0x9f   : > { %v1208_v5 = vmul.f32 %v2648_v50, %v1191_v22  ;;  %v825_v9 = vadd.f32 %v819_v58, %v796_v40  ;;  %v841_v19 = vmul.f32 %v2422_v6, %v2381_v45  ;;  %v851_v0 = vrot.slane %v837_v57, 1  ;;  %v2714_v57 = vld [vmem:[#allocation2 + $0x48] sm:$0xff] }
  0xa0   : > { %v832_v1 = vadd.f32 %v829_v46, %v824_v28  ;;  %v854_v16 = vrot.slane %v838_v53, 1  ;;  %v866_v29 = vmul.f32 %v2430_v14, %v2162_v31  ;;  %v867_v51 = vmul.f32 %v2430_v14, %v2395_v47  ;;  %v2678_v31 = vld [vmem:[#allocation2 + $0x10] sm:$0xfe] }
  0xa1   : > { %v833_v18 = vadd.f32 %v830_v59, %v825_v9  ;;  %v852_v12 = vrot.slane %v840_v54, 1  ;;  %v855_v43 = vrot.slane %v841_v19, 1  ;;  %v869_v30 = vmul.f32 %v2430_v14, %v2177_v39  ;;  %v2686_v39 = vld [vmem:[#allocation2 + $0x30] sm:$0x1]  ;;  %v2722_v53 = vld [vmem:[#allocation2 + $0x50] sm:$0xfe] }
  0xa2   : > { %1216 = vrot.lane.b32.xlu2 %v1208_v5, %s2063_s18  ;;  %v870_v45 = vmul.f32 %v2430_v14, %v2399_v8  ;;  %v880_v6 = vrot.slane %v866_v29, 2  ;;  %v883_v25 = vrot.slane %v867_v51, 2  ;;  %v901_v3 = vsel %vm590_vm5, %v2487_v21, %v900_v11 }
  0xa3   : > { %v853_v47 = vsel %vm283_vm1, %v851_v0, %v852_v12  ;;  %v856_v34 = vsel %vm283_vm1, %v854_v16, %v855_v43  ;;  %v881_v56 = vrot.slane %v869_v30, 2  ;;  %v1038_v15 = vmul.f32 %v2562_v32, %v2166_v33  ;;  %v2732_v16 = vld [vmem:[#allocation2 + $0x68] sm:$0x1]  ;;  %v2740_v43 = vld [vmem:[#allocation2 + $0x48] sm:$0xfc] }
  0xa4   : > { %v861_v37 = vadd.f32 %v853_v47, %v832_v1  ;;  %v862_v8 = vadd.f32 %v856_v34, %v833_v18  ;;  %v884_v14 = vrot.slane %v870_v45, 2  ;;  %v1039_v52 = vmul.f32 %v2562_v32, %v2342_v23  ;;  %v2708_v32 = vld [vmem:[#allocation2 + $0x30] sm:$0x3]  ;;  %v2730_v1 = vld [vmem:[#allocation2 + $0x48] sm:$0xfe] }
  0xa5   : > { %v882_v60 = vsel %vm319_vm2, %v880_v6, %v881_v56  ;;  %v1049_v21 = vmul.f32 %v2565_v20, %v2676_v62  ;;  %v1050_v35 = vmul.f32 %v2565_v20, %v2678_v31  ;;  %v1052_v33 = vmul.f32 %v2565_v20, %v2684_v17 }
  0xa6   : > { %v885_v46 = vsel %vm319_vm2, %v883_v25, %v884_v14  ;;  %v890_v22 = vadd.f32 %v882_v60, %v861_v37  ;;  %v1053_v44 = vmul.f32 %v2565_v20, %v2686_v39  ;;  %v1084_v59 = vmul.f32 %v2574_v61, %v2690_v36  ;;  %v2755_v37 = vld [vmem:[#allocation2 + $0x68] sm:$0x3] }
  0xa7   : > { %v891_v38 = vadd.f32 %v885_v46, %v862_v8  ;;  %v1061_v40 = vrot.slane %v1049_v21, 1  ;;  %v1064_v10 = vrot.slane %v1050_v35, 1  ;;  %v1062_v20 = vrot.slane %v1052_v33, 1 }
  0xa8   : > { %v2718_v5 = vmul.f32 %v901_v3, %v890_v22  ;;  %v1065_v58 = vrot.slane %v1053_v44, 1  ;;  %v1085_v28 = vmul.f32 %v2574_v61, %v2699_v24  ;;  %v1087_v54 = vmul.f32 %v2574_v61, %v2706_v4  ;;  %v2753_v3 = vld [vmem:[#allocation2 + $0x50] sm:$0xfc] }
  0xa9   : > { %v907_v9 = vmul.f32 %v900_v11, %v891_v38  ;;  %v1088_v19 = vmul.f32 %v2574_v61, %v2708_v32  ;;  %v1096_v0 = vrot.slane %v1084_v59, 2  ;;  %v1063_v29 = vsel %vm283_vm1, %v1061_v40, %v1062_v20  ;;  %v2738_v11 = vld [vmem:[#allocation2 + $0x70] sm:$0x1] }
  0xaa   : > { %v1066_v51 = vsel %vm283_vm1, %v1064_v10, %v1065_v58  ;;  %v1099_v18 = vrot.slane %v1085_v28, 2  ;;  %v1116_v12 = vmul.f32 %v2577_v55, %v2714_v57  ;;  %v1073_v30 = vadd.f32 %v1063_v29, %v1038_v15  ;;  %v2763_v15 = vld [vmem:[#allocation2 + $0x70] sm:$0x3] }
  0xab   : > { %v1074_v45 = vadd.f32 %v1066_v51, %v1039_v52  ;;  %v1097_v61 = vrot.slane %v1087_v54, 2  ;;  %v1100_v6 = vrot.slane %v1088_v19, 2  ;;  %915 = vrot.lane.b32.xlu0 %v907_v9, %s2054_s23  ;;  %v1117_v25 = vmul.f32 %v2577_v55, %v2369_v7  ;;  %v1198_v54 = vpop.permute.xlu0 %1197 }
  0xac   : > { %v1130_v47 = vmul.f32 %v2584_v26, %v2730_v1  ;;  %v1131_v34 = vmul.f32 %v2584_v26, %v2722_v53  ;;  %v1133_v56 = vmul.f32 %v2584_v26, %v2732_v16  ;;  %v1134_v55 = vmul.f32 %v2584_v26, %v2738_v11 }
  0xad   : > { %v1098_v8 = vsel %vm319_vm2, %v1096_v0, %v1097_v61  ;;  %v1101_v14 = vsel %vm319_vm2, %v1099_v18, %v1100_v6  ;;  %v1165_v60 = vmul.f32 %v2589_v48, %v2740_v43  ;;  %v1166_v44 = vmul.f32 %v2589_v48, %v2753_v3 }
  0xae   : > { %v1108_v52 = vadd.f32 %v1098_v8, %v1073_v30  ;;  %v1109_v21 = vadd.f32 %v1101_v14, %v1074_v45  ;;  %v1142_v35 = vrot.slane %v1130_v47, 1  ;;  %v1143_v46 = vrot.slane %v1133_v56, 1 }
  0xaf   : > { %v1145_v22 = vrot.slane %v1131_v34, 1  ;;  %v1146_v33 = vrot.slane %v1134_v55, 1  ;;  %v1168_v26 = vmul.f32 %v2589_v48, %v2755_v37  ;;  %v1169_v59 = vmul.f32 %v2589_v48, %v2763_v15 }
  0xb0   : > { %v1119_v38 = vadd.f32 %v1116_v12, %v1108_v52  ;;  %v1120_v40 = vadd.f32 %v1117_v25, %v1109_v21  ;;  %v1144_v10 = vsel %vm283_vm1, %v1142_v35, %v1143_v46  ;;  %v1177_v58 = vrot.slane %v1165_v60, 2  ;;  %v2795_v52 = vld [vmem:[#allocation2] sm:$0xff] }
  0xb1   : > { %v1147_v20 = vsel %vm283_vm1, %v1145_v22, %v1146_v33  ;;  %v1178_v28 = vrot.slane %v1168_v26, 2  ;;  %v1180_v9 = vrot.slane %v1166_v44, 2  ;;  %v1181_v29 = vrot.slane %v1169_v59, 2  ;;  %v3133_v59 = vld [vmem:[#allocation8_spill] sm:$0xff] }
  0xb2   : > { %v1154_v19 = vadd.f32 %v1144_v10, %v1119_v38  ;;  %v1155_v0 = vadd.f32 %v1147_v20, %v1120_v40  ;;  %v1202_v18 = vsel %vm1201_vm6, %v1198_v54, %v2648_v50  ;;  %v1233_v12 = vstv %s2716_s6  ;;  %s3049_s6 = sld [smem:[#allocation3 + $0x24]] }
  0xb3   : > { %v1179_v51 = vsel %vm319_vm2, %v1177_v58, %v1178_v28  ;;  %v1262_v30 = vstv %s2724_s7  ;;  %v1182_v48 = vsel %vm319_vm2, %v1180_v9, %v1181_v29  ;;  %v1228_v61 = vstv %s2710_s5  ;;  %s3047_s5 = sld [smem:[#allocation3 + $0x1b]] }
  0xb4   : > { %v1189_v45 = vadd.f32 %v1179_v51, %v1154_v19  ;;  %v2785_v6 = vstv %s2757_s10  ;;  %v1190_v25 = vadd.f32 %v1182_v48, %v1155_v0  ;;  %v1291_v47 = vstv %s2742_s8  ;;  %s3051_s7 = sld [smem:[#allocation3 + $0x2d]]  ;;  %s1950_s8 = sshll.u32 %s3137_s13, 4 }
  0xb5   : > { %v2789_v34 = vstv %s2767_s11  ;;  %v1236_v56 = vmul.f32 %v1233_v12, %v2567_v63  ;;  %v1239_v14 = vmul.f32 %v1233_v12, %v2569_v49  ;;  %v1265_v55 = vmul.f32 %v1262_v30, %v2579_v42 }
  0xb6   : > { %v1206_v8 = vmul.f32 %v1198_v54, %v1189_v45  ;;  %v1268_v50 = vmul.f32 %v1262_v30, %v2581_v13  ;;  %v1207_v60 = vmul.f32 %v1202_v18, %v1190_v25  ;;  %v1231_v21 = vmul.f32 %v2795_v52, %v1228_v61  ;;  %v2811_v54 = vld [vmem:[#allocation2 + $0x8] sm:$0xff] }
  0xb7   : > { %v1252_v35 = vrot.slane %v1236_v56, 1  ;;  %v1302_v46 = vmul.f32 %v2785_v6, %v2586_v2  ;;  %v1253_v22 = vrot.slane %v1239_v14, 1  ;;  %v1281_v33 = vrot.slane %v1265_v55, 2 }
  0xb8   : > { %v1282_v44 = vrot.slane %v1268_v50, 2  ;;  %v1305_v26 = vmul.f32 %v2785_v6, %v2596_v27  ;;  %1212 = vrot.lane.b32.xlu0 %v1206_v8, %s2063_s18  ;;  %v1294_v38 = vmul.f32 %v2795_v52, %v1291_v47  ;;  %v1331_v10 = vmul.f32 %v2789_v34, %v2603_v41  ;;  %1214 = vrot.lane.b32.xlu1 %v1207_v60, %s2063_s18  ;;  %s255_s18 = sld [smem:[#allocation3]] }
  0xb9   : > { %v1318_v40 = vrot.slane %v1302_v46, 1  ;;  %v1334_v20 = vmul.f32 %v2789_v34, %v3133_v59  ;;  %v1254_v58 = vsel %vm283_vm1, %v1252_v35, %v1253_v22  ;;  %v1229_v19 = vmul.f32 %v2811_v54, %v1228_v61 }
  0xba   : > { %v1283_v28 = vsel %vm319_vm2, %v1281_v33, %v1282_v44  ;;  %v1319_v9 = vrot.slane %v1305_v26, 1  ;;  %v1260_v0 = vadd.f32 %v1254_v58, %v1231_v21  ;;  %v1347_v29 = vrot.slane %v1331_v10, 2 }
  0xbb   : > { %v1348_v51 = vrot.slane %v1334_v20, 2  ;;  %v1230_v18 = vmul.f32 %v1228_v61, %v2342_v23  ;;  %v1234_v45 = vmul.f32 %v1233_v12, %v2676_v62  ;;  %v1235_v25 = vmul.f32 %v1233_v12, %v2678_v31 }
  0xbc   : > { %v1320_v48 = vsel %vm283_vm1, %v1318_v40, %v1319_v9  ;;  %v1237_v56 = vmul.f32 %v1233_v12, %v2684_v17  ;;  %v1289_v8 = vadd.f32 %v1283_v28, %v1260_v0  ;;  %v1238_v55 = vmul.f32 %v1233_v12, %v2686_v39  ;;  %v1364_v28 = vpop.permute.xlu0 %1363 }
  0xbd   : > { %v1349_v14 = vsel %vm319_vm2, %v1347_v29, %v1348_v51  ;;  %v1263_v50 = vmul.f32 %v1262_v30, %v2690_v36  ;;  %v1246_v60 = vrot.slane %v1234_v45, 1  ;;  %v1249_v35 = vrot.slane %v1235_v25, 1 }
  0xbe   : > { %v1247_v21 = vrot.slane %v1237_v56, 1  ;;  %v1264_v23 = vmul.f32 %v1262_v30, %v2699_v24  ;;  %v1297_v61 = vadd.f32 %v1294_v38, %v1289_v8  ;;  %v1250_v46 = vrot.slane %v1238_v55, 1 }
  0xbf   : > { %v1266_v22 = vmul.f32 %v1262_v30, %v2706_v4  ;;  %v1267_v33 = vmul.f32 %v1262_v30, %v2708_v32  ;;  %v1275_v26 = vrot.slane %v1263_v50, 2  ;;  %v1292_v40 = vmul.f32 %v1291_v47, %v2714_v57 }
  0xc0   : > { %v1248_v44 = vsel %vm283_vm1, %v1246_v60, %v1247_v21  ;;  %v1278_v12 = vrot.slane %v1264_v23, 2  ;;  %v1326_v10 = vadd.f32 %v1320_v48, %v1297_v61  ;;  %v1251_v20 = vsel %vm283_vm1, %v1249_v35, %v1250_v46 }
  0xc1   : > { %v1258_v38 = vadd.f32 %v1248_v44, %v1229_v19  ;;  %v1276_v58 = vrot.slane %v1266_v22, 2  ;;  %v1259_v9 = vadd.f32 %v1251_v20, %v1230_v18  ;;  %v1279_v30 = vrot.slane %v1267_v33, 2 }
  0xc2   : > { %v1293_v0 = vmul.f32 %v1291_v47, %v2369_v7  ;;  %v1300_v29 = vmul.f32 %v2785_v6, %v2730_v1  ;;  %v1355_v51 = vadd.f32 %v1349_v14, %v1326_v10  ;;  %v1301_v48 = vmul.f32 %v2785_v6, %v2722_v53 }
  0xc3   : > { %v1277_v45 = vsel %vm319_vm2, %v1275_v26, %v1276_v58  ;;  %v1303_v19 = vmul.f32 %v2785_v6, %v2732_v16  ;;  %v1280_v18 = vsel %vm319_vm2, %v1278_v12, %v1279_v30  ;;  %v1304_v7 = vmul.f32 %v2785_v6, %v2738_v11  ;;  %v1362_v6 = vpop.permute.xlu2 %1361 }
  0xc4   : > { %v1287_v25 = vadd.f32 %v1277_v45, %v1258_v38  ;;  %v1312_v47 = vrot.slane %v1300_v29, 1  ;;  %v1372_v56 = vmul.f32 %v1364_v28, %v1355_v51  ;;  %v1288_v8 = vadd.f32 %v1280_v18, %v1259_v9 }
  0xc5   : > { %v1313_v14 = vrot.slane %v1303_v19, 1  ;;  %v1315_v55 = vrot.slane %v1301_v48, 1  ;;  %v1316_v60 = vrot.slane %v1304_v7, 1  ;;  %v1329_v21 = vmul.f32 %v2789_v34, %v2740_v43 }
  0xc6   : > { %v1295_v50 = vadd.f32 %v1292_v40, %v1287_v25  ;;  %v1330_v35 = vmul.f32 %v2789_v34, %v2753_v3  ;;  %1380 = vrot.lane.b32.xlu2 %v1372_v56, %s2064_s22  ;;  %v1296_v23 = vadd.f32 %v1293_v0, %v1288_v8  ;;  %v1332_v46 = vmul.f32 %v2789_v34, %v2755_v37 }
  0xc7   : > { %v1314_v61 = vsel %vm283_vm1, %v1312_v47, %v1313_v14  ;;  %v1333_v22 = vmul.f32 %v2789_v34, %v2763_v15  ;;  %v1317_v33 = vsel %vm283_vm1, %v1315_v55, %v1316_v60  ;;  %v1341_v26 = vrot.slane %v1329_v21, 2 }
  0xc8   : > { %v1324_v44 = vadd.f32 %v1314_v61, %v1295_v50  ;;  %v1344_v12 = vrot.slane %v1330_v35, 2  ;;  %v1325_v40 = vadd.f32 %v1317_v33, %v1296_v23  ;;  %v1342_v10 = vrot.slane %v1332_v46, 2  ;;  %v3134_v50 = vld [vmem:[#allocation7_spill] sm:$0xff] }
  0xc9   : > { %v1345_v20 = vrot.slane %v1333_v22, 2  ;;  %v1366_v38 = vsel %vm1365_vm7, %v1362_v6, %v1364_v28  ;;  %v1392_v58 = vstv %s2829_s16  ;;  %v1397_v9 = vstv %s2825_s14  ;;  %s184_s14 = scalar_lea.vmem %s3123_s3, %s1950_s8 }
  0xca   : > { %v1426_v30 = vstv %s2832_s17  ;;  %v1343_v0 = vsel %vm319_vm2, %v1341_v26, %v1342_v10  ;;  %v2869_v51 = vstv %s2844_s20  ;;  %v2872_v34 = vstv %s2837_s19 }
  0xcb   : > { %v1346_v29 = vsel %vm319_vm2, %v1344_v12, %v1345_v20  ;;  %v1353_v45 = vadd.f32 %v1343_v0, %v1324_v44  ;;  %v2875_v19 = vstv %s2849_s21  ;;  %v1398_v18 = vmul.f32 %v1397_v9, %v2676_v62  ;;  %v2898_v12 = vld [vmem:[#allocation2 + $0x10] sm:$0xff] }
  0xcc   : > { %v1354_v48 = vadd.f32 %v1346_v29, %v1325_v40  ;;  %v1393_v25 = vmul.f32 %v2811_v54, %v1392_v58  ;;  %v1401_v28 = vmul.f32 %v1397_v9, %v2684_v17  ;;  %v1427_v7 = vmul.f32 %v1426_v30, %v2690_v36 }
  0xcd   : > { %v1430_v47 = vmul.f32 %v1426_v30, %v2706_v4  ;;  %v1370_v56 = vmul.f32 %v1362_v6, %v1353_v45  ;;  %v1410_v14 = vrot.slane %v1398_v18, 1  ;;  %v1464_v55 = vmul.f32 %v2872_v34, %v2730_v1 }
  0xce   : > { %v1371_v8 = vmul.f32 %v1366_v38, %v1354_v48  ;;  %586 = vrot.lane.b32.xlu2 %v3134_v50, %s2055_s26  ;;  %v1411_v60 = vrot.slane %v1401_v28, 1  ;;  %v1439_v21 = vrot.slane %v1427_v7, 2  ;;  %v1467_v23 = vmul.f32 %v2872_v34, %v2732_v16  ;;  %s2912_s26 = sld [smem:[#allocation3 + $0x8]] }
  0xcf   : > { %v1440_v35 = vrot.slane %v1430_v47, 2  ;;  %v1456_v61 = vmul.f32 %v2869_v51, %v2714_v57  ;;  %v1476_v6 = vrot.slane %v1464_v55, 1  ;;  %v1493_v46 = vmul.f32 %v2875_v19, %v2740_v43  ;;  %1376 = vrot.lane.b32.xlu0 %v1370_v56, %s2064_s22 }
  0xd0   : > { %1378 = vrot.lane.b32.xlu1 %v1371_v8, %s2064_s22  ;;  %v1496_v22 = vmul.f32 %v2875_v19, %v2755_v37  ;;  %v1412_v33 = vsel %vm283_vm1, %v1410_v14, %v1411_v60  ;;  %v1477_v26 = vrot.slane %v1467_v23, 1  ;;  %v1394_v40 = vmul.f32 %v2898_v12, %v1392_v58 }
  0xd1   : > { %v1441_v44 = vsel %vm319_vm2, %v1439_v21, %v1440_v35  ;;  %v1422_v10 = vadd.f32 %v1412_v33, %v1393_v25  ;;  %v1505_v20 = vrot.slane %v1493_v46, 2  ;;  %v1395_v0 = vmul.f32 %v2795_v52, %v1392_v58 }
  0xd2   : > { %v1506_v38 = vrot.slane %v1496_v22, 2  ;;  %v1478_v29 = vsel %vm283_vm1, %v1476_v6, %v1477_v26  ;;  %v1399_v45 = vmul.f32 %v1397_v9, %v2678_v31  ;;  %v1400_v48 = vmul.f32 %v1397_v9, %v2567_v63  ;;  %v2915_v6 = vld [vmem:[#allocation2 + $0x50] sm:$0xff]  ;;  %v3135_v22 = vld [vmem:[#allocation6_spill] sm:$0xff] }
  0xd3   : > { %v1402_v18 = vmul.f32 %v1397_v9, %v2686_v39  ;;  %v1451_v28 = vadd.f32 %v1441_v44, %v1422_v10  ;;  %v1403_v47 = vmul.f32 %v1397_v9, %v2569_v49  ;;  %v1428_v56 = vmul.f32 %v1426_v30, %v2699_v24 }
  0xd4   : > { %v1507_v7 = vsel %vm319_vm2, %v1505_v20, %v1506_v38  ;;  %v1413_v25 = vrot.slane %v1399_v45, 1  ;;  %v1416_v14 = vrot.slane %v1400_v48, 1  ;;  %v1429_v58 = vmul.f32 %v1426_v30, %v2579_v42 }
  0xd5   : > { %v1414_v8 = vrot.slane %v1402_v18, 1  ;;  %v1459_v55 = vadd.f32 %v1456_v61, %v1451_v28  ;;  %v1417_v50 = vrot.slane %v1403_v47, 1  ;;  %v1431_v60 = vmul.f32 %v1426_v30, %v2708_v32 }
  0xd6   : > { %v1432_v21 = vmul.f32 %v1426_v30, %v2581_v13  ;;  %v1442_v23 = vrot.slane %v1428_v56, 2  ;;  %v1445_v9 = vrot.slane %v1429_v58, 2  ;;  %v1457_v46 = vmul.f32 %v2915_v6, %v2869_v51  ;;  %750 = vrot.lane.b32.xlu2 %v3135_v22, %s2062_s29  ;;  %s2065_s29 = smov 95  }
  0xd7   : > { %v1415_v35 = vsel %vm283_vm1, %v1413_v25, %v1414_v8  ;;  %v1488_v61 = vadd.f32 %v1478_v29, %v1459_v55  ;;  %v1418_v33 = vsel %vm283_vm1, %v1416_v14, %v1417_v50  ;;  %v1443_v44 = vrot.slane %v1431_v60, 2  ;;  %v1528_v60 = vpop.permute.xlu2 %1527 }
  0xd8   : > { %v1423_v30 = vadd.f32 %v1415_v35, %v1394_v40  ;;  %v1424_v26 = vadd.f32 %v1418_v33, %v1395_v0  ;;  %v1446_v10 = vrot.slane %v1432_v21, 2  ;;  %v1458_v20 = vmul.f32 %v2795_v52, %v2869_v51  ;;  %v1526_v0 = vpop.permute.xlu1 %1525 }
  0xd9   : > { %v1465_v38 = vmul.f32 %v2872_v34, %v2722_v53  ;;  %v1517_v45 = vadd.f32 %v1507_v7, %v1488_v61  ;;  %v1444_v48 = vsel %vm319_vm2, %v1442_v23, %v1443_v44  ;;  %v1466_v29 = vmul.f32 %v2872_v34, %v2586_v2 }
  0xda   : > { %v1468_v40 = vmul.f32 %v2872_v34, %v2738_v11  ;;  %v1447_v18 = vsel %vm319_vm2, %v1445_v9, %v1446_v10  ;;  %v1452_v51 = vadd.f32 %v1444_v48, %v1423_v30  ;;  %v1469_v28 = vmul.f32 %v2872_v34, %v2596_v27 }
  0xdb   : > { %v1479_v47 = vrot.slane %v1465_v38, 1  ;;  %v1534_v7 = vmul.f32 %v1526_v0, %v1517_v45  ;;  %v1453_v56 = vadd.f32 %v1447_v18, %v1424_v26  ;;  %v1482_v8 = vrot.slane %v1466_v29, 1 }
  0xdc   : > { %v1480_v25 = vrot.slane %v1468_v40, 1  ;;  %v1460_v14 = vadd.f32 %v1457_v46, %v1452_v51  ;;  %v1483_v58 = vrot.slane %v1469_v28, 1  ;;  %v1494_v55 = vmul.f32 %v2875_v19, %v2753_v3 }
  0xdd   : > { %v1495_v50 = vmul.f32 %v2875_v19, %v2603_v41  ;;  %v1461_v21 = vadd.f32 %v1458_v20, %v1453_v56  ;;  %v1497_v35 = vmul.f32 %v2875_v19, %v2763_v15  ;;  %v1498_v23 = vmul.f32 %v2875_v19, %v3133_v59  ;;  %1540 = vrot.lane.b32.xlu0 %v1534_v7, %s2065_s29 }
  0xde   : > { %v1481_v34 = vsel %vm283_vm1, %v1479_v47, %v1480_v25  ;;  %v1484_v9 = vsel %vm283_vm1, %v1482_v8, %v1483_v58  ;;  %v1508_v22 = vrot.slane %v1494_v55, 2  ;;  %913 = vrot.lane.b32.xlu2 %v2718_v5, %s2054_s23  ;;  %v1530_v26 = vsel %vm1529_vm8, %v1526_v0, %v1528_v60  ;;  %s2066_s23 = smov 94  }
  0xdf   : > { %v1489_v46 = vadd.f32 %v1481_v34, %v1460_v14  ;;  %v1511_v61 = vrot.slane %v1495_v50, 2  ;;  %v1490_v33 = vadd.f32 %v1484_v9, %v1461_v21  ;;  %v1509_v30 = vrot.slane %v1497_v35, 2 }
  0xe0   : > { %v1512_v44 = vrot.slane %v1498_v23, 2  ;;  %v1556_v19 = vstv %s2912_s26  ;;  %v1561_v10 = vstv %s2921_s25  ;;  %v1590_v20 = vstv %s2924_s27 }
  0xe1   : > { %v1510_v38 = vsel %vm319_vm2, %v1508_v22, %v1509_v30  ;;  %v1619_v48 = vstv %s2937_s28  ;;  %v2965_v29 = vstv %s2930_s24  ;;  %v2968_v51 = vstv %s2942_s9 }
  0xe2   : > { %v1513_v45 = vsel %vm319_vm2, %v1511_v61, %v1512_v44  ;;  %v1518_v40 = vadd.f32 %v1510_v38, %v1489_v46  ;;  %v1564_v5 = vmul.f32 %v1561_v10, %v2567_v63  ;;  %v1559_v28 = vmul.f32 %v2795_v52, %v1556_v19 }
  0xe3   : > { %v1519_v18 = vadd.f32 %v1513_v45, %v1490_v33  ;;  %v1567_v0 = vmul.f32 %v1561_v10, %v2569_v49  ;;  %v1593_v47 = vmul.f32 %v1590_v20, %v2579_v42  ;;  %v1596_v7 = vmul.f32 %v1590_v20, %v2581_v13 }
  0xe4   : > { %v1535_v56 = vmul.f32 %v1530_v26, %v1518_v40  ;;  %v1580_v8 = vrot.slane %v1564_v5, 1  ;;  %v1630_v14 = vmul.f32 %v2965_v29, %v2586_v2  ;;  %v1633_v63 = vmul.f32 %v2965_v29, %v2596_v27 }
  0xe5   : > { %v1536_v25 = vmul.f32 %v1528_v60, %v1519_v18  ;;  %v1581_v58 = vrot.slane %v1567_v0, 1  ;;  %v1609_v55 = vrot.slane %v1593_v47, 2  ;;  %v1610_v50 = vrot.slane %v1596_v7, 2 }
  0xe6   : > { %1542 = vrot.lane.b32.xlu1 %v1535_v56, %s2065_s29  ;;  %v1622_v49 = vmul.f32 %v2795_v52, %v1619_v48  ;;  %v1646_v21 = vrot.slane %v1630_v14, 1  ;;  %v1659_v42 = vmul.f32 %v2968_v51, %v2603_v41  ;;  %v1662_v13 = vmul.f32 %v2968_v51, %v3133_v59  ;;  %v1692_v14 = vpop.permute.xlu1 %1691 }
  0xe7   : > { %1544 = vrot.lane.b32.xlu2 %v1536_v25, %s2065_s29  ;;  %v1582_v2 = vsel %vm283_vm1, %v1580_v8, %v1581_v58  ;;  %v1611_v60 = vsel %vm319_vm2, %v1609_v55, %v1610_v50  ;;  %v1647_v34 = vrot.slane %v1633_v63, 1  ;;  %v1557_v27 = vmul.f32 %v2811_v54, %v1556_v19 }
  0xe8   : > { %v1588_v35 = vadd.f32 %v1582_v2, %v1559_v28  ;;  %v1675_v23 = vrot.slane %v1659_v42, 2  ;;  %v1676_v9 = vrot.slane %v1662_v13, 2  ;;  %v1558_v46 = vmul.f32 %v2898_v12, %v1556_v19 }
  0xe9   : > { %v1648_v22 = vsel %vm283_vm1, %v1646_v21, %v1647_v34  ;;  %v1562_v41 = vmul.f32 %v1561_v10, %v2676_v62  ;;  %v1563_v59 = vmul.f32 %v1561_v10, %v2678_v31  ;;  %v1565_v61 = vmul.f32 %v1561_v10, %v2684_v17 }
  0xea   : > { %v1617_v33 = vadd.f32 %v1611_v60, %v1588_v35  ;;  %v1677_v30 = vsel %vm319_vm2, %v1675_v23, %v1676_v9  ;;  %v1566_v44 = vmul.f32 %v1561_v10, %v2686_v39  ;;  %v1591_v26 = vmul.f32 %v1590_v20, %v2690_v36 }
  0xeb   : > { %v1574_v38 = vrot.slane %v1562_v41, 1  ;;  %v1575_v45 = vrot.slane %v1565_v61, 1  ;;  %v1577_v40 = vrot.slane %v1563_v59, 1  ;;  %v1592_v19 = vmul.f32 %v1590_v20, %v2699_v24 }
  0xec   : > { %v1625_v18 = vadd.f32 %v1622_v49, %v1617_v33  ;;  %v1578_v5 = vrot.slane %v1566_v44, 1  ;;  %v1594_v62 = vmul.f32 %v1590_v20, %v2706_v4  ;;  %v1595_v31 = vmul.f32 %v1590_v20, %v2708_v32  ;;  %v3027_v33 = vpop.permute.xlu2 %420 }
  0xed   : > { %v1576_v17 = vsel %vm283_vm1, %v1574_v38, %v1575_v45  ;;  %v1603_v28 = vrot.slane %v1591_v26, 2  ;;  %v1606_v0 = vrot.slane %v1592_v19, 2  ;;  %v1620_v39 = vmul.f32 %v1619_v48, %v2714_v57 }
  0xee   : > { %v1654_v10 = vadd.f32 %v1648_v22, %v1625_v18  ;;  %v1579_v36 = vsel %vm283_vm1, %v1577_v40, %v1578_v5  ;;  %v1586_v47 = vadd.f32 %v1576_v17, %v1557_v27  ;;  %v1604_v7 = vrot.slane %v1594_v62, 2  ;;  %v3031_v44 = vpop.permute.xlu1 %1022  ;;  %v2000_v5 = vld [vmem:[#allocation2] sm:$0xfe] }
  0xef   : > { %v1587_v56 = vadd.f32 %v1579_v36, %v1558_v46  ;;  %v1607_v24 = vrot.slane %v1595_v31, 2  ;;  %v1621_v25 = vmul.f32 %v2915_v6, %v1619_v48  ;;  %v1628_v4 = vmul.f32 %v2965_v29, %v2730_v1  ;;  %v2001_v31 = vld [vmem:[#allocation2 + $0x20] sm:$0x1] }
  0xf0   : > { %v1683_v32 = vadd.f32 %v1677_v30, %v1654_v10  ;;  %v1605_v20 = vsel %vm319_vm2, %v1603_v28, %v1604_v7  ;;  %v1629_v8 = vmul.f32 %v2965_v29, %v2722_v53  ;;  %v1631_v57 = vmul.f32 %v2965_v29, %v2732_v16  ;;  %v2002_v10 = vld [vmem:[#allocation2 + $0x10] sm:$0xfe] }
  0xf1   : > { %v1608_v58 = vsel %vm319_vm2, %v1606_v0, %v1607_v24  ;;  %v1615_v55 = vadd.f32 %v1605_v20, %v1586_v47  ;;  %v1632_v50 = vmul.f32 %v2965_v29, %v2738_v11  ;;  %v1640_v48 = vrot.slane %v1628_v4, 1  ;;  %v1690_v29 = vpop.permute.xlu0 %1689  ;;  %v2003_v47 = vld [vmem:[#allocation2 + $0x30] sm:$0x1]  ;;  %v2004_v24 = vld [vmem:[#allocation2 + $0x8] sm:$0xfe] }
  0xf2   : > { %v1700_v63 = vmul.f32 %v1692_v14, %v1683_v32  ;;  %v1616_v49 = vadd.f32 %v1608_v58, %v1587_v56  ;;  %v1641_v1 = vrot.slane %v1631_v57, 1  ;;  %v1643_v21 = vrot.slane %v1629_v8, 1  ;;  %v2005_v4 = vld [vmem:[#allocation2 + $0x28] sm:$0x1]  ;;  %v2006_v57 = vld [vmem:[#allocation2] sm:$0xfc] }
  0xf3   : > { %v1623_v42 = vadd.f32 %v1620_v39, %v1615_v55  ;;  %v1644_v13 = vrot.slane %v1632_v50, 1  ;;  %v1657_v53 = vmul.f32 %v2968_v51, %v2740_v43  ;;  %v1658_v16 = vmul.f32 %v2968_v51, %v2753_v3  ;;  %v2007_v58 = vld [vmem:[#allocation2 + $0x20] sm:$0x3] }
  0xf4   : > { %v1624_v2 = vadd.f32 %v1621_v25, %v1616_v49  ;;  %v1642_v60 = vsel %vm283_vm1, %v1640_v48, %v1641_v1  ;;  %v1660_v34 = vmul.f32 %v2968_v51, %v2755_v37  ;;  %v1661_v11 = vmul.f32 %v2968_v51, %v2763_v15  ;;  %1708 = vrot.lane.b32.xlu2 %v1700_v63, %s2066_s23  ;;  %v3029_v30 = vpop.permute.xlu2 %1024  ;;  %v2008_v63 = vld [vmem:[#allocation2 + $0x10] sm:$0xfc]  ;;  %v2009_v1 = vld [vmem:[#allocation2 + $0x30] sm:$0x3] }
  0xf5   : > { %v1645_v27 = vsel %vm283_vm1, %v1643_v21, %v1644_v13  ;;  %v1652_v35 = vadd.f32 %v1642_v60, %v1623_v42  ;;  %v1669_v23 = vrot.slane %v1657_v53, 2  ;;  %v1672_v43 = vrot.slane %v1658_v16, 2  ;;  %v2010_v53 = vld [vmem:[#allocation2 + $0x8] sm:$0xfc] }
  0xf6   : > { %v1653_v9 = vadd.f32 %v1645_v27, %v1624_v2  ;;  %v1670_v46 = vrot.slane %v1660_v34, 2  ;;  %v1673_v3 = vrot.slane %v1661_v11, 2  ;;  %v1694_v37 = vsel %vm1693_vm9, %v1690_v29, %v1692_v14  ;;  %v3037_v45 = vpop.permute.xlu1 %584  ;;  %v2011_v2 = vld [vmem:[#allocation2 + $0x28] sm:$0x3] }
  0xf7   : > { %v270_v19 = vstv %s1875_s4  ;;  %v306_v39 = vstv %s1876_s30  ;;  %v259_v56 = vstv %s255_s18 }
  0xf8   : > { %v1671_v22 = vsel %vm319_vm2, %v1669_v23, %v1670_v46  ;;  %v1674_v41 = vsel %vm319_vm2, %v1672_v43, %v1673_v3  ;;  %v271_v62 = vmul.f32 %v2000_v5, %v270_v19  ;;  %v274_v17 = vmul.f32 %v2001_v31, %v270_v19 }
  0xf9   : > { %v1681_v59 = vadd.f32 %v1671_v22, %v1652_v35  ;;  %v1682_v61 = vadd.f32 %v1674_v41, %v1653_v9  ;;  %v3033_v26 = vpop.permute.xlu0 %422  ;;  %v273_v36 = vmul.f32 %v2002_v10, %v270_v19  ;;  %v276_v7 = vmul.f32 %v2003_v47, %v270_v19  ;;  %v2013_v10 = vld [vmem:[#allocation2 + $0x70] sm:$0x1]  ;;  %v2014_v47 = vld [vmem:[#allocation2 + $0x40] sm:$0xfe] }
  0xfa   : > { %v272_v25 = vmul.f32 %v2004_v24, %v270_v19  ;;  %v275_v32 = vmul.f32 %v2005_v4, %v270_v19  ;;  %v284_v20 = vrot.slane %v271_v62, 1  ;;  %v285_v8 = vrot.slane %v274_v17, 1  ;;  %v2012_v17 = vld [vmem:[#allocation2 + $0x50] sm:$0xfe]  ;;  %v2016_v4 = vld [vmem:[#allocation2 + $0x40] sm:$0xfc] }
  0xfb   : > { %v1698_v15 = vmul.f32 %v1690_v29, %v1681_v59  ;;  %v1699_v51 = vmul.f32 %v1694_v37, %v1682_v61  ;;  %v307_v14 = vmul.f32 %v2006_v57, %v306_v39  ;;  %v310_v55 = vmul.f32 %v2007_v58, %v306_v39 }
  0xfc   : > { %v3035_v38 = vpop.permute.xlu2 %1216  ;;  %v290_v50 = vrot.slane %v273_v36, 1  ;;  %v291_v48 = vrot.slane %v276_v7, 1  ;;  %v309_v49 = vmul.f32 %v2008_v63, %v306_v39  ;;  %v312_v21 = vmul.f32 %v2009_v1, %v306_v39 }
  0xfd   : > { %1706 = vrot.lane.b32.xlu1 %v1699_v51, %s2066_s23  ;;  %1704 = vrot.lane.b32.xlu0 %v1698_v15, %s2066_s23  ;;  %v287_v42 = vrot.slane %v272_v25, 1  ;;  %v288_v13 = vrot.slane %v275_v32, 1  ;;  %v308_v16 = vmul.f32 %v2010_v53, %v306_v39  ;;  %v311_v60 = vmul.f32 %v2011_v2, %v306_v39 }
  0xfe   : > { %v3043_v28 = vpop.permute.xlu1 %748  ;;  %v260_v34 = vmul.f32 %v2795_v52, %v259_v56  ;;  %v320_v11 = vrot.slane %v307_v14, 2  ;;  %v321_v29 = vrot.slane %v310_v55, 2  ;;  %v262_v27 = vmul.f32 %v2898_v12, %v259_v56  ;;  %v2018_v14 = vld [vmem:[#allocation2 + $0x68] sm:$0x1] }
  0xff   : > { %v286_v35 = vsel %vm283_vm1, %v284_v20, %v285_v8  ;;  %v292_v23 = vsel %vm283_vm1, %v290_v50, %v291_v48  ;;  %v326_v43 = vrot.slane %v309_v49, 2  ;;  %v327_v9 = vrot.slane %v312_v21, 2  ;;  %v2017_v8 = vld [vmem:[#allocation2 + $0x48] sm:$0xfe]  ;;  %v2019_v50 = vld [vmem:[#allocation2 + $0x60] sm:$0x3] }
 0x100   : > { %v339_v3 = vstv %s3047_s5  ;;  %v261_v22 = vmul.f32 %v2811_v54, %v259_v56  ;;  %v353_v59 = vstv %s3049_s6  ;;  %v289_v61 = vsel %vm283_vm1, %v287_v42, %v288_v13  ;;  %v2015_v56 = vld [vmem:[#allocation2 + $0x60] sm:$0x1]  ;;  %v2020_v21 = vld [vmem:[#allocation2 + $0x50] sm:$0xfc]  ;;  %v2021_v13 = vld [vmem:[#allocation2 + $0x70] sm:$0x3] }
 0x101   : > { %v3039_v40 = vpop.permute.xlu0 %588  ;;  %v323_v15 = vrot.slane %v308_v16, 2  ;;  %v324_v12 = vrot.slane %v311_v60, 2  ;;  %v296_v51 = vadd.f32 %v286_v35, %v260_v34  ;;  %v388_v19 = vstv %s3051_s7  ;;  %v2022_v34 = vld [vmem:[#allocation2 + $0x48] sm:$0xff] }
 0x102   : > { %v298_v5 = vadd.f32 %v292_v23, %v262_v27  ;;  %v322_v62 = vsel %vm319_vm2, %v320_v11, %v321_v29  ;;  %v328_v31 = vsel %vm319_vm2, %v326_v43, %v327_v9  ;;  %v356_v39 = vmul.f32 %v2012_v17, %v353_v59  ;;  %v2023_v35 = vld [vmem:[#allocation2 + $0x48] sm:$0xfc]  ;;  %v2024_v43 = vld [vmem:[#allocation2 + $0x68] sm:$0x3] }
 0x103   : > { %v359_v54 = vmul.f32 %v2013_v10, %v353_v59  ;;  %v340_v36 = vmul.f32 %v2795_v52, %v339_v3  ;;  %v354_v7 = vmul.f32 %v2014_v47, %v353_v59  ;;  %v357_v24 = vmul.f32 %v2015_v56, %v353_v59 }
 0x104   : > { %v297_v25 = vadd.f32 %v289_v61, %v261_v22  ;;  %v389_v32 = vmul.f32 %v2016_v4, %v388_v19  ;;  %v325_v20 = vsel %vm319_vm2, %v323_v15, %v324_v12  ;;  %v355_v57 = vmul.f32 %v2017_v8, %v353_v59 }
 0x105   : > { %v358_v58 = vmul.f32 %v2018_v14, %v353_v59  ;;  %v332_v55 = vadd.f32 %v322_v62, %v296_v51  ;;  %v392_v48 = vmul.f32 %v2019_v50, %v388_v19  ;;  %v334_v63 = vadd.f32 %v328_v31, %v298_v5 }
 0x106   : > { %v3061_v41 = vpop.permute.xlu1 %911  ;;  %v342_v49 = vmul.f32 %v2915_v6, %v339_v3  ;;  %v372_v52 = vrot.slane %v356_v39, 1  ;;  %v373_v1 = vrot.slane %v359_v54, 1  ;;  %v391_v42 = vmul.f32 %v2020_v21, %v388_v19 }
 0x107   : > { %v394_v53 = vmul.f32 %v2021_v13, %v388_v19  ;;  %v366_v16 = vrot.slane %v354_v7, 1  ;;  %v367_v2 = vrot.slane %v357_v24, 1  ;;  %v333_v60 = vadd.f32 %v325_v20, %v297_v25 }
 0x108   : > { %v341_v11 = vmul.f32 %v2022_v34, %v339_v3  ;;  %v369_v29 = vrot.slane %v355_v57, 1  ;;  %v370_v27 = vrot.slane %v358_v58, 1  ;;  %v390_v23 = vmul.f32 %v2023_v35, %v388_v19 }
 0x109   : > { %v3045_v0 = vpop.permute.xlu0 %752  ;;  %v393_v9 = vmul.f32 %v2024_v43, %v388_v19  ;;  %v345_v59 = vadd.f32 %v342_v49, %v334_v63  ;;  %v343_v15 = vadd.f32 %v340_v36, %v332_v55  ;;  %v374_v12 = vsel %vm283_vm1, %v372_v52, %v373_v1 }
 0x10a   : > { %v407_v51 = vrot.slane %v391_v42, 2  ;;  %v408_v5 = vrot.slane %v394_v53, 2  ;;  %v368_v62 = vsel %vm283_vm1, %v366_v16, %v367_v2  ;;  %v401_v31 = vrot.slane %v389_v32, 2 }
 0x10b   : > { %v402_v17 = vrot.slane %v392_v48, 2  ;;  %v344_v3 = vadd.f32 %v341_v11, %v333_v60  ;;  %v371_v39 = vsel %vm283_vm1, %v369_v29, %v370_v27  ;;  %v404_v10 = vrot.slane %v390_v23, 2 }
 0x10c   : > { %v405_v54 = vrot.slane %v393_v9, 2  ;;  %v380_v47 = vadd.f32 %v374_v12, %v345_v59  ;;  %v378_v19 = vadd.f32 %v368_v62, %v343_v15  ;;  %v409_v7 = vsel %vm319_vm2, %v407_v51, %v408_v5 }
 0x10d   : > { %v403_v56 = vsel %vm319_vm2, %v401_v31, %v402_v17  ;;  %v379_v36 = vadd.f32 %v371_v39, %v344_v3  ;;  %v425_v14 = vsel %vm424_vm10, %v3027_v33, %v3033_v26 }
 0x10e   : > { %v406_v24 = vsel %vm319_vm2, %v404_v10, %v405_v54  ;;  %v415_v25 = vadd.f32 %v409_v7, %v380_v47  ;;  %v413_v4 = vadd.f32 %v403_v56, %v378_v19 }
 0x10f   : > { %v414_v32 = vadd.f32 %v406_v24, %v379_v36 }
 0x110   : > { %v431_v58 = vmul.f32 %v3033_v26, %v415_v25  ;;  %v429_v50 = vmul.f32 %v3027_v33, %v413_v4 }
 0x111   : > { %v430_v63 = vmul.f32 %v425_v14, %v414_v32 }
 0x112   : > { %v598_v49 = vadd.f32 %v3039_v40, %v431_v58 }
 0x114   : > { %v762_v26 = vadd.f32 %v3045_v0, %v598_v49 }
 0x11d   : > { %v3063_v37 = vpop.permute.xlu0 %915 }
 0x120   : > { %v3041_v18 = vpop.permute.xlu2 %1380 }
 0x128   : > { %v3057_v46 = vpop.permute.xlu2 %586 }
 0x129   : > { %v591_v55 = vsel %vm590_vm5, %v3037_v45, %v3057_v46  ;;  %v592_v48 = vsel %vm590_vm5, %v3057_v46, %v3039_v40  ;;  %v924_v46 = vadd.f32 %v3063_v37, %v762_v26 }
 0x12a   : > { %v1215_v6 = vpop.permute.xlu1 %1214  ;;  %v1213_v61 = vpop.permute.xlu0 %1212  ;;  %v596_v1 = vadd.f32 %v591_v55, %v429_v50  ;;  %v597_v42 = vadd.f32 %v592_v48, %v430_v63 }
 0x12b   : > { %v1032_v34 = vadd.f32 %v3029_v30, %v924_v46  ;;  %v1219_v11 = vsel %vm1218_vm12, %v1213_v61, %v1215_v6 }
 0x130   : > { %v751_v22 = vpop.permute.xlu2 %750 }
 0x131   : > { %v755_v52 = vsel %vm754_vm11, %v3043_v28, %v751_v22  ;;  %v756_v21 = vsel %vm754_vm11, %v751_v22, %v3045_v0  ;;  %v1026_v0 = vsel %vm424_vm10, %v3031_v44, %v3029_v30 }
 0x132   : > { %v760_v13 = vadd.f32 %v755_v52, %v596_v1  ;;  %v761_v53 = vadd.f32 %v756_v21, %v597_v42 }
 0x138   : > { %v914_v20 = vpop.permute.xlu2 %913 }
 0x139   : > { %v917_v45 = vsel %vm573_vm4, %v3061_v41, %v914_v20  ;;  %v918_v33 = vsel %vm573_vm4, %v914_v20, %v3063_v37  ;;  %v1220_v37 = vsel %vm1218_vm12, %v1215_v6, %v3035_v38 }
 0x13a   : > { %v922_v16 = vadd.f32 %v917_v45, %v760_v13  ;;  %v923_v2 = vadd.f32 %v918_v33, %v761_v53  ;;  %v1226_v43 = vadd.f32 %v1220_v37, %v1032_v34 }
 0x13c   : > { %v1030_v41 = vadd.f32 %v3031_v44, %v922_v16  ;;  %v1031_v29 = vadd.f32 %v1026_v0, %v923_v2 }
 0x13e   : > { %v1224_v27 = vadd.f32 %v1213_v61, %v1030_v41  ;;  %v1225_v9 = vadd.f32 %v1219_v11, %v1031_v29 }
 0x141   : > { %v1377_v57 = vpop.permute.xlu0 %1376  ;;  %v1545_v40 = vpop.permute.xlu2 %1544 }
 0x142   : > { %v1379_v8 = vpop.permute.xlu1 %1378  ;;  %v1388_v22 = vadd.f32 %v1377_v57, %v1224_v27 }
 0x143   : > { %v1384_v35 = vsel %vm1382_vm13, %v1379_v8, %v3041_v18  ;;  %v1383_v23 = vsel %vm1382_vm13, %v1377_v57, %v1379_v8 }
 0x144   : > { %v1390_v12 = vadd.f32 %v1384_v35, %v1226_v43  ;;  %v1389_v51 = vadd.f32 %v1383_v23, %v1225_v9 }
 0x14e   : > { %v1709_v30 = vpop.permute.xlu2 %1708 }
 0x14f   : > { %v1541_v60 = vpop.permute.xlu0 %1540 }
 0x150   : > { %v1552_v5 = vadd.f32 %v1541_v60, %v1388_v22 }
 0x158   : > { %v1543_v28 = vpop.permute.xlu1 %1542 }
 0x159   : > { %v1548_v59 = vsel %vm1546_vm14, %v1543_v28, %v1545_v40  ;;  %v1547_v15 = vsel %vm1546_vm14, %v1541_v60, %v1543_v28 }
 0x15a   : > { %v1554_v44 = vadd.f32 %v1548_v59, %v1390_v12  ;;  %v1553_v62 = vadd.f32 %v1547_v15, %v1389_v51 }
 0x16f   : > { %v1707_v31 = vpop.permute.xlu1 %1706  ;;  %v1705_v17 = vpop.permute.xlu0 %1704 }
 0x170   : > { %v1712_v3 = vsel %vm1710_vm15, %v1707_v31, %v1709_v30  ;;  %v1711_v38 = vsel %vm1710_vm15, %v1705_v17, %v1707_v31  ;;  %v1716_v6 = vadd.f32 %v1705_v17, %v1552_v5 }
 0x171   : > { %v1718_v61 = vadd.f32 %v1712_v3, %v1554_v44  ;;  %v1717_v18 = vadd.f32 %v1711_v38, %v1553_v62 }
 0x172   : > { %v1944_v39 = vmul.f32 -1.442695, %v1716_v6 }
 0x173   : > { %v1946_v10 = vmul.f32 -1.442695, %v1718_v61  ;;  %v1945_v54 = vmul.f32 -1.442695, %v1717_v18 }
 0x174   : > { %1984 = vpow2.f32 %v1944_v39 }
 0x175   : > { %1986 = vpow2.f32 %v1946_v10 }
 0x176   : > { %1988 = vpow2.f32 %v1945_v54 }
 0x17a   : > { %v1985_v47 = vpop.eup %1984 }
 0x17b   : > { %v1987_v19 = vpop.eup %1986  ;;  %v1728_v7 = vadd.f32 1.0, %v1985_v47 }
 0x17c   : > { %v1989_v56 = vpop.eup %1988  ;;  %v1730_v36 = vadd.f32 1.0, %v1987_v19 }
 0x17d   : > { %v1729_v24 = vadd.f32 1.0, %v1989_v56  ;;  %1990 = vrcp.f32 %v1728_v7  ;;  %vm1736_vm0 = vweird.f32 %v1728_v7  ;;  %v1740_v55 = vand.u32 2147483647, %v1728_v7 }
 0x17e   : > { %1992 = vrcp.f32 %v1730_v36  ;;  %v1742_v50 = vand.u32 2147483648, %v1728_v7  ;;  %v1772_v48 = vand.u32 2147483648, %v1730_v36  ;;  %v1770_v1 = vand.u32 2147483647, %v1730_v36 }
 0x17f   : > { %1994 = vrcp.f32 %v1729_v24  ;;  %v1757_v21 = vand.u32 2147483648, %v1729_v24  ;;  %v1755_v45 = vand.u32 2147483647, %v1729_v24  ;;  %vm1766_vm4 = vweird.f32 %v1730_v36 }
 0x180   : > { %vm1741_vm6 = vcmp.eq.f32.partialorder %v1740_v55, 8.507059e+37  ;;  %v1743_v33 = vor.u32 1.1754944e-38, %v1742_v50  ;;  %v1773_v53 = vor.u32 1.1754944e-38, %v1772_v48  ;;  %vm1751_vm8 = vweird.f32 %v1729_v24 }
 0x181   : > { %vm1771_vm10 = vcmp.eq.f32.partialorder %v1770_v1, 8.507059e+37  ;;  %v1758_v28 = vor.u32 1.1754944e-38, %v1757_v21  ;;  %vm1756_vm12 = vcmp.eq.f32.partialorder %v1755_v45, 8.507059e+37 }
 0x183   : > { %v1991_v25 = vpop.eup %1990 }
 0x184   : > { %v1993_v4 = vpop.eup %1992  ;;  %v1732_v20 = vmul.f32 %v1991_v25, %v1728_v7  ;;  %vm1737_vm1 = vweird.f32 %v1991_v25 }
 0x185   : > { %v1995_v32 = vpop.eup %1994  ;;  %v1762_v8 = vmul.f32 %v1993_v4, %v1730_v36  ;;  %vm1767_vm2 = vweird.f32 %v1993_v4  ;;  %vm1738_vm5 = vmor %vm1736_vm0, %vm1737_vm1 }
 0x186   : > { %v1733_v57 = vsub.f32 1.0, %v1732_v20  ;;  %v1747_v14 = vmul.f32 %v1995_v32, %v1729_v24  ;;  %vm1752_vm3 = vweird.f32 %v1995_v32  ;;  %vm1768_vm7 = vmor %vm1766_vm4, %vm1767_vm2 }
 0x187   : > { %v1763_v58 = vsub.f32 1.0, %v1762_v8  ;;  %vm1753_vm11 = vmor %vm1751_vm8, %vm1752_vm3 }
 0x188   : > { %v1734_v63 = vmul.f32 %v1991_v25, %v1733_v57  ;;  %v1748_v49 = vsub.f32 1.0, %v1747_v14 }
 0x189   : > { %v1764_v52 = vmul.f32 %v1993_v4, %v1763_v58 }
 0x18a   : > { %v1735_v42 = vadd.f32 %v1991_v25, %v1734_v63  ;;  %v1749_v26 = vmul.f32 %v1995_v32, %v1748_v49 }
 0x18b   : > { %v1765_v13 = vadd.f32 %v1993_v4, %v1764_v52 }
 0x18c   : > { %v1739_v46 = vsel %vm1738_vm5, %v1991_v25, %v1735_v42  ;;  %v1750_v16 = vadd.f32 %v1995_v32, %v1749_v26 }
 0x18d   : > { %v1769_v40 = vsel %vm1768_vm7, %v1993_v4, %v1765_v13  ;;  %v1744_v2 = vsel %vm1741_vm6, %v1743_v33, %v1739_v46 }
 0x18e   : > { %v1774_v60 = vsel %vm1771_vm10, %v1773_v53, %v1769_v40  ;;  %1779 = vrot.lane.b32.xlu0 %v1744_v2, %s2060_s15  ;;  %v1754_v34 = vsel %vm1753_vm11, %v1995_v32, %v1750_v16 }
 0x18f   : > { %1783 = vrot.lane.b32.xlu2 %v1774_v60, %s2060_s15  ;;  %v1759_v0 = vsel %vm1756_vm12, %v1758_v28, %v1754_v34 }
 0x190   : > { %1781 = vrot.lane.b32.xlu1 %v1759_v0, %s2060_s15 }
 0x1e9   : > { %v1784_v11 = vpop.permute.xlu2 %1783 }
 0x200   : > { %v1780_v41 = vpop.permute.xlu0 %1779 }
 0x202   : > { %v1782_v29 = vpop.permute.xlu1 %1781 }
 0x203   : > { %v1785_v37 = vsel %vm1693_vm9, %v1780_v41, %v1782_v29  ;;  %v1786_v27 = vsel %vm1693_vm9, %v1782_v29, %v1784_v11 }
 0x204   : > { %1789 = vst [vmem:[%s184_s14] sm:$0xff] %v1785_v37 }
 0x205   : > { %1790 = vst [vmem:[%s184_s14 + $0x8] sm:$0xff] %v1786_v27 }
 0x206 PF: > { %s14_s12 = sadd.s32 1, %s2050_s12  }
 0x207   : > { %p11_p7 = scmp.ge.s32.totalorder %s14_s12, 4  }
 0x209   :  { %13 = sbr.rel (!%p11_p7) target bundleno = 1 (0x1), region = 83 }
 0x20e   :  { %1812 = vsyncpa [#allocation4], 1 }
 0x20f   :  { %1814 = vsyncpa [#allocation4 + $0x1], 1 }

</bundles_post_ra>
